<compile_context>
chip_gen: v6e
topology: v6e:2x2x1
jax: 0.10.0
libtpu: 0.0.40
codegen_flags: <defaults>
</compile_context>

<pallas_src>
import functools
import math

import jax
import jax.numpy as jnp
from jax.experimental import pallas as pl
from jax.experimental.pallas import tpu as pltpu


# ----------------------------- in-kernel helpers -----------------------------

def _layernorm(x, g, b, eps):
    mean = jnp.mean(x, axis=-1, keepdims=True)
    xc = x - mean
    var = jnp.mean(xc * xc, axis=-1, keepdims=True)
    return xc * jax.lax.rsqrt(var + eps) * g + b


def _gelu(x):
    # TODO(synk): HF "gelu" is erf-based; tanh approximation used because erf
    # lowering on Mosaic is not guaranteed across TPU generations.
    c = 0.7978845608028654  # sqrt(2/pi)
    return 0.5 * x * (1.0 + jnp.tanh(c * (x + 0.044715 * x * x * x)))


# ----------------------------- fused BertLayer kernel -----------------------------

def _bert_layer_kernel(
    x_ref,        # (S, H)       f32   hidden states of one batch element
    mask_ref,     # (1, S)       f32   additive attention mask (0 / -10000)
    qkv_w_ref,    # (H, 3H)      bf16  [Wq | Wk | Wv]
    qkv_b_ref,    # (1, 3H)      f32
    ao_w_ref,     # (nH, dh, H)  bf16  attention output proj, split per head
    ao_b_ref,     # (1, H)       f32
    ln1_g_ref,    # (1, H)       f32
    ln1_b_ref,    # (1, H)       f32
    i_w_ref,      # (H, I)       bf16
    i_b_ref,      # (1, I)       f32
    o_w_ref,      # (I, H)       bf16
    o_b_ref,      # (1, H)       f32
    ln2_g_ref,    # (1, H)       f32
    ln2_b_ref,    # (1, H)       f32
    out_ref,      # (S, H)       f32
    qkv_scratch,  # (S, 3H)      f32 VMEM scratch for the fused QKV projection
    *, n_heads, scale, eps,
):
    x = x_ref[...]                                   # (S, H) f32
    S, H = x.shape
    dh = H // n_heads
    mask = mask_ref[...]                             # (1, S)

    # ---- fused QKV projection: one MXU matmul over the concatenated weights.
    qkv_scratch[...] = (
        jnp.dot(x.astype(jnp.bfloat16), qkv_w_ref[...],
                preferred_element_type=jnp.float32)
        + qkv_b_ref[...])

    # ---- multi-head self-attention; head merge fused into the output
    #      projection: attn = sum_h softmax(q_h k_h^T * scale + mask) v_h @ Wo[h].
    #      head_mask[i] is None in the HF eval path -> no-op.
    attn = jnp.zeros((S, H), jnp.float32)
    for h in range(n_heads):                         # static unroll (nH small)
        qh = qkv_scratch[:, h * dh:(h + 1) * dh].astype(jnp.bfloat16)
        kh = qkv_scratch[:, H + h * dh:H + (h + 1) * dh].astype(jnp.bfloat16)
        vh = qkv_scratch[:, 2 * H + h * dh:2 * H + (h + 1) * dh].astype(jnp.bfloat16)

        s = jax.lax.dot_general(                     # (S, S), no explicit K^T
            qh, kh, (((1,), (1,)), ((), ())),
            preferred_element_type=jnp.float32) * scale + mask
        s = s - jnp.max(s, axis=-1, keepdims=True)
        p = jnp.exp(s)
        p = p * pl.reciprocal(jnp.sum(p, axis=-1, keepdims=True), approx=True)

        ctx = jnp.dot(p.astype(jnp.bfloat16), vh,
                      preferred_element_type=jnp.float32)            # (S, dh)
        attn = attn + jnp.dot(ctx.astype(jnp.bfloat16), ao_w_ref[h],
                              preferred_element_type=jnp.float32)    # (S, H)

    # ---- BertSelfOutput: dense (bias) + residual + LayerNorm (dropout = no-op, eval)
    attn = attn + ao_b_ref[...]
    h1 = _layernorm(attn + x, ln1_g_ref[...], ln1_b_ref[...], eps)

    # ---- BertIntermediate (GELU) + BertOutput: dense + residual + LayerNorm
    inter = _gelu(jnp.dot(h1.astype(jnp.bfloat16), i_w_ref[...],
                          preferred_element_type=jnp.float32) + i_b_ref[...])
    out = jnp.dot(inter.astype(jnp.bfloat16), o_w_ref[...],
                  preferred_element_type=jnp.float32) + o_b_ref[...]
    h2 = _layernorm(out + h1, ln2_g_ref[...], ln2_b_ref[...], eps)

    out_ref[...] = h2.astype(out_ref.dtype)


# ----------------------------- wrappers -----------------------------

def pack_layer_params(p, n_heads):
    """HF-style per-layer params -> packed / bf16-cast params for the fused kernel."""
    H = p["q_w"].shape[0]
    I = p["i_w"].shape[1]
    dh = H // n_heads
    return dict(
        qkv_w=jnp.concatenate([p["q_w"], p["k_w"], p["v_w"]], axis=1).astype(jnp.bfloat16),
        qkv_b=jnp.concatenate([p["q_b"], p["k_b"], p["v_b"]]).reshape(1, 3 * H),
        ao_w=p["ao_w"].reshape(n_heads, dh, H).astype(jnp.bfloat16),
        ao_b=p["ao_b"].reshape(1, H),
        ln1_g=p["ln1_g"].reshape(1, H), ln1_b=p["ln1_b"].reshape(1, H),
        i_w=p["i_w"].astype(jnp.bfloat16), i_b=p["i_b"].reshape(1, I),
        o_w=p["o_w"].astype(jnp.bfloat16), o_b=p["o_b"].reshape(1, H),
        ln2_g=p["ln2_g"].reshape(1, H), ln2_b=p["ln2_b"].reshape(1, H),
    )


def bert_layer_forward(hidden, attn_mask, p, n_heads, eps=1e-12):
    """One fused BertLayer.  hidden: [B, S, H]; attn_mask: [B, 1, S] additive."""
    B, S, H = hidden.shape
    I = p["i_w"].shape[1]
    dh = H // n_heads
    scale = 1.0 / math.sqrt(dh)

    def whole(shape):
        zeros = (0,) * len(shape)
        return pl.BlockSpec(shape, lambda b, _z=zeros: _z)

    flops = 2 * B * S * (4 * H * H + 2 * H * I) + 4 * B * n_heads * S * S * dh
    transcendentals = B * (n_heads * S * S + S * I)      # exp + tanh
    bytes_accessed = (8 * B * S * H                      # activations in + out (f32)
                      + 2 * (4 * H * H + 2 * H * I)      # bf16 weights
                      + 4 * B * S)                       # mask
    cost = pl.CostEstimate(flops=flops, transcendentals=transcendentals,
                           bytes_accessed=bytes_accessed)

    kernel = functools.partial(_bert_layer_kernel,
                               n_heads=n_heads, scale=scale, eps=eps)

    return pl.pallas_call(
        kernel,
        out_shape=jax.ShapeDtypeStruct((B, S, H), jnp.float32),
        grid=(B,),
        in_specs=[
            pl.BlockSpec((None, S, H), lambda b: (b, 0, 0)),    # hidden states
            pl.BlockSpec((None, 1, S), lambda b: (b, 0, 0)),    # additive mask
            whole((H, 3 * H)), whole((1, 3 * H)),               # fused QKV
            whole((n_heads, dh, H)), whole((1, H)),             # attn output proj
            whole((1, H)), whole((1, H)),                       # LayerNorm 1
            whole((H, I)), whole((1, I)),                       # intermediate
            whole((I, H)), whole((1, H)),                       # output dense
            whole((1, H)), whole((1, H)),                       # LayerNorm 2
        ],
        out_specs=pl.BlockSpec((None, S, H), lambda b: (b, 0, 0)),
        scratch_shapes=[pltpu.VMEM((S, 3 * H), jnp.float32)],
        compiler_params=pltpu.CompilerParams(
            dimension_semantics=("parallel",),
            vmem_limit_bytes=64 * 1024 * 1024),
        cost_estimate=cost,
    )(hidden, attn_mask,
      p["qkv_w"], p["qkv_b"], p["ao_w"], p["ao_b"],
      p["ln1_g"], p["ln1_b"], p["i_w"], p["i_b"],
      p["o_w"], p["o_b"], p["ln2_g"], p["ln2_b"])


def bert_encoder_forward(hidden_states, attention_mask, scc_params, n_heads):
    # Inference path (self.training == False): inference_layers = self.scc_layer.
    # output_hidden_states / output_attentions are False (config defaults) and
    # head_mask[i] is None (HF get_head_mask(None)), so outputs = (hidden_states,).
    for layer_params in scc_params:
        hidden_states = bert_layer_forward(hidden_states, attention_mask,
                                           layer_params, n_heads)
    return (hidden_states,)


# ----------------------------- main -----------------------------

if __name__ == "__main__":
    B, S, H, nH, I = 2, 8, 32, 4, 64
    prd_n_layer, scc_n_layer = 4, 2          # compress_ratio = 2 (prd layers unused at eval)

    key = jax.random.PRNGKey(0)
    key, kx = jax.random.split(key)
    hidden_states = jax.random.normal(kx, (B, S, H), jnp.float32)

    # attention mask: 1 = attend, 0 = mask; last 2 tokens of batch 1 masked.
    am = jnp.ones((B, S), jnp.float32).at[1, -2:].set(0.0)
    attn_mask = ((1.0 - am) * -10000.0).reshape(B, 1, S)   # additive, [B, 1, S]

    def init_layer(k):
        ks = jax.random.split(k, 6)

        def lin(kk, fan_in, fan_out):
            return jax.random.normal(kk, (fan_in, fan_out), jnp.float32) * 0.02

        return dict(
            q_w=lin(ks[0], H, H), q_b=jnp.zeros((H,), jnp.float32),
            k_w=lin(ks[1], H, H), k_b=jnp.zeros((H,), jnp.float32),
            v_w=lin(ks[2], H, H), v_b=jnp.zeros((H,), jnp.float32),
            ao_w=lin(ks[3], H, H), ao_b=jnp.zeros((H,), jnp.float32),
            ln1_g=jnp.ones((H,), jnp.float32), ln1_b=jnp.zeros((H,), jnp.float32),
            i_w=lin(ks[4], H, I), i_b=jnp.zeros((I,), jnp.float32),
            o_w=lin(ks[5], I, H), o_b=jnp.zeros((H,), jnp.float32),
            ln2_g=jnp.ones((H,), jnp.float32), ln2_b=jnp.zeros((H,), jnp.float32),
        )

    key, *lkeys = jax.random.split(key, scc_n_layer + 1)
    scc_params = [pack_layer_params(init_layer(k), nH) for k in lkeys]

    fwd = jax.jit(functools.partial(bert_encoder_forward, n_heads=nH))
    outputs = fwd(hidden_states, attn_mask, scc_params)
    hs = jax.block_until_ready(outputs[0])
    assert hs.shape == (B, S, H) and hs.dtype == jnp.float32
    assert bool(jnp.all(jnp.isfinite(hs)))
    print("KERNEL_OK")
</pallas_src>

<mosaic_0001>
module attributes {stable_mosaic.version = 11 : i64} {
  func.func @_bert_layer_kernel(%arg0: i32, %arg1: memref<1x8x32xf32, #tpu.memory_space<vmem>>, %arg2: memref<1x1x8xf32, #tpu.memory_space<vmem>>, %arg3: memref<32x96xbf16, #tpu.memory_space<vmem>>, %arg4: memref<1x96xf32, #tpu.memory_space<vmem>>, %arg5: memref<4x8x32xbf16, #tpu.memory_space<vmem>>, %arg6: memref<1x32xf32, #tpu.memory_space<vmem>>, %arg7: memref<1x32xf32, #tpu.memory_space<vmem>>, %arg8: memref<1x32xf32, #tpu.memory_space<vmem>>, %arg9: memref<32x64xbf16, #tpu.memory_space<vmem>>, %arg10: memref<1x64xf32, #tpu.memory_space<vmem>>, %arg11: memref<64x32xbf16, #tpu.memory_space<vmem>>, %arg12: memref<1x32xf32, #tpu.memory_space<vmem>>, %arg13: memref<1x32xf32, #tpu.memory_space<vmem>>, %arg14: memref<1x32xf32, #tpu.memory_space<vmem>>, %arg15: memref<1x8x32xf32, #tpu.memory_space<vmem>>, %arg16: memref<8x96xf32, #tpu.memory_space<vmem>>) attributes {dimension_semantics = [#tpu.dimension_semantics<parallel>], iteration_bounds = array<i64: 2>, scalar_prefetch = 0 : i64, scratch_operands = 1 : i64, tpu.core_type = #tpu.core_type<tc>, window_params = [{transform_indices = @transform_0, window_bounds = array<i64: 1, 8, 32>}, {transform_indices = @transform_1, window_bounds = array<i64: 1, 1, 8>}, {pipeline_mode = #tpu.pipeline_mode<synchronous>, transform_indices = @transform_2, window_bounds = array<i64: 32, 96>}, {pipeline_mode = #tpu.pipeline_mode<synchronous>, transform_indices = @transform_3, window_bounds = array<i64: 1, 96>}, {pipeline_mode = #tpu.pipeline_mode<synchronous>, transform_indices = @transform_4, window_bounds = array<i64: 4, 8, 32>}, {pipeline_mode = #tpu.pipeline_mode<synchronous>, transform_indices = @transform_5, window_bounds = array<i64: 1, 32>}, {pipeline_mode = #tpu.pipeline_mode<synchronous>, transform_indices = @transform_6, window_bounds = array<i64: 1, 32>}, {pipeline_mode = #tpu.pipeline_mode<synchronous>, transform_indices = @transform_7, window_bounds = array<i64: 1, 32>}, {pipeline_mode = #tpu.pipeline_mode<synchronous>, transform_indices = @transform_8, window_bounds = array<i64: 32, 64>}, {pipeline_mode = #tpu.pipeline_mode<synchronous>, transform_indices = @transform_9, window_bounds = array<i64: 1, 64>}, {pipeline_mode = #tpu.pipeline_mode<synchronous>, transform_indices = @transform_10, window_bounds = array<i64: 64, 32>}, {pipeline_mode = #tpu.pipeline_mode<synchronous>, transform_indices = @transform_11, window_bounds = array<i64: 1, 32>}, {pipeline_mode = #tpu.pipeline_mode<synchronous>, transform_indices = @transform_12, window_bounds = array<i64: 1, 32>}, {pipeline_mode = #tpu.pipeline_mode<synchronous>, transform_indices = @transform_13, window_bounds = array<i64: 1, 32>}, {transform_indices = @transform_14, window_bounds = array<i64: 1, 8, 32>}]} {
    %c0 = arith.constant 0 : index
    %c0_0 = arith.constant 0 : index
    %c0_1 = arith.constant 0 : index
    %0 = vector.load %arg1[%c0, %c0_0, %c0_1] : memref<1x8x32xf32, #tpu.memory_space<vmem>>, vector<1x8x32xf32>
    %1 = vector.shape_cast %0 : vector<1x8x32xf32> to vector<8x32xf32>
    %c0_2 = arith.constant 0 : index
    %c0_3 = arith.constant 0 : index
    %c0_4 = arith.constant 0 : index
    %2 = vector.load %arg2[%c0_2, %c0_3, %c0_4] : memref<1x1x8xf32, #tpu.memory_space<vmem>>, vector<1x1x8xf32>
    %3 = vector.shape_cast %2 : vector<1x1x8xf32> to vector<1x8xf32>
    %4 = arith.truncf %1 : vector<8x32xf32> to vector<8x32xbf16>
    %c0_5 = arith.constant 0 : index
    %c0_6 = arith.constant 0 : index
    %5 = vector.load %arg3[%c0_5, %c0_6] : memref<32x96xbf16, #tpu.memory_space<vmem>>, vector<32x96xbf16>
    %cst = arith.constant dense<0.000000e+00> : vector<8x96xf32>
    %6 = tpu.matmul %4, %5, %cst {dimension_numbers = #tpu.dot_dimension_numbers<[1], [0], [0], [1], [0, 0, 1, 1], [], []>} : vector<8x32xbf16>, vector<32x96xbf16>, vector<8x96xf32> -> vector<8x96xf32>
    %c0_7 = arith.constant 0 : index
    %c0_8 = arith.constant 0 : index
    %7 = vector.load %arg4[%c0_7, %c0_8] : memref<1x96xf32, #tpu.memory_space<vmem>>, vector<1x96xf32>
    %8 = vector.broadcast %7 : vector<1x96xf32> to vector<8x96xf32>
    %9 = arith.addf %6, %8 : vector<8x96xf32>
    %c0_9 = arith.constant 0 : index
    %c0_10 = arith.constant 0 : index
    %10 = vector.load %arg16[%c0_9, %c0_10] : memref<8x96xf32, #tpu.memory_space<vmem>>, vector<8x96xf32>
    tpu.vector_store %arg16[%c0_9, %c0_10], %9 {strides = array<i32>} : memref<8x96xf32, #tpu.memory_space<vmem>>, vector<8x96xf32>,
    %cst_11 = arith.constant 0.000000e+00 : f32
    %11 = vector.broadcast %cst_11 : f32 to vector<8x32xf32>
    %c0_12 = arith.constant 0 : index
    %c0_13 = arith.constant 0 : index
    %12 = vector.load %arg16[%c0_12, %c0_13] : memref<8x96xf32, #tpu.memory_space<vmem>>, vector<8x8xf32>
    %13 = arith.truncf %12 : vector<8x8xf32> to vector<8x8xbf16>
    %c0_14 = arith.constant 0 : index
    %c32 = arith.constant 32 : index
    %14 = vector.load %arg16[%c0_14, %c32] : memref<8x96xf32, #tpu.memory_space<vmem>>, vector<8x8xf32>
    %15 = arith.truncf %14 : vector<8x8xf32> to vector<8x8xbf16>
    %c0_15 = arith.constant 0 : index
    %c64 = arith.constant 64 : index
    %16 = vector.load %arg16[%c0_15, %c64] : memref<8x96xf32, #tpu.memory_space<vmem>>, vector<8x8xf32>
    %17 = arith.truncf %16 : vector<8x8xf32> to vector<8x8xbf16>
    %cst_16 = arith.constant dense<0.000000e+00> : vector<8x8xf32>
    %18 = tpu.matmul %13, %15, %cst_16 {dimension_numbers = #tpu.dot_dimension_numbers<[1], [1], [0], [0], [0, 0, 1, 0], [], []>} : vector<8x8xbf16>, vector<8x8xbf16>, vector<8x8xf32> -> vector<8x8xf32>
    %cst_17 = arith.constant 0.353553385 : f32
    %19 = vector.broadcast %cst_17 : f32 to vector<8x8xf32>
    %20 = arith.mulf %18, %19 : vector<8x8xf32>
    %21 = vector.broadcast %3 : vector<1x8xf32> to vector<8x8xf32>
    %22 = arith.addf %20, %21 : vector<8x8xf32>
    %cst_18 = arith.constant dense<0xFF800000> : vector<8xf32>
    %23 = vector.multi_reduction <maximumf>, %22, %cst_18 [1] : vector<8x8xf32> to vector<8xf32>
    %24 = vector.shape_cast %23 : vector<8xf32> to vector<8x1xf32>
    %25 = vector.broadcast %24 : vector<8x1xf32> to vector<8x8xf32>
    %26 = arith.subf %22, %25 : vector<8x8xf32>
    %27 = math.exp %26 : vector<8x8xf32>
    %cst_19 = arith.constant dense<0.000000e+00> : vector<8xf32>
    %28 = vector.multi_reduction <add>, %27, %cst_19 [1] : vector<8x8xf32> to vector<8xf32>
    %29 = vector.shape_cast %28 : vector<8xf32> to vector<8x1xf32>
    %30 = tpu.reciprocal %29 {approx = true} : vector<8x1xf32> -> vector<8x1xf32>
    %31 = vector.broadcast %30 : vector<8x1xf32> to vector<8x8xf32>
    %32 = arith.mulf %27, %31 : vector<8x8xf32>
    %33 = arith.truncf %32 : vector<8x8xf32> to vector<8x8xbf16>
    %cst_20 = arith.constant dense<0.000000e+00> : vector<8x8xf32>
    %34 = tpu.matmul %33, %17, %cst_20 {dimension_numbers = #tpu.dot_dimension_numbers<[1], [0], [0], [1], [0, 0, 1, 1], [], []>} : vector<8x8xbf16>, vector<8x8xbf16>, vector<8x8xf32> -> vector<8x8xf32>
    %35 = arith.truncf %34 : vector<8x8xf32> to vector<8x8xbf16>
    %c0_21 = arith.constant 0 : index
    %c0_22 = arith.constant 0 : index
    %c0_23 = arith.constant 0 : index
    %36 = vector.load %arg5[%c0_21, %c0_22, %c0_23] : memref<4x8x32xbf16, #tpu.memory_space<vmem>>, vector<1x8x32xbf16>
    %37 = vector.shape_cast %36 : vector<1x8x32xbf16> to vector<8x32xbf16>
    %cst_24 = arith.constant dense<0.000000e+00> : vector<8x32xf32>
    %38 = tpu.matmul %35, %37, %cst_24 {dimension_numbers = #tpu.dot_dimension_numbers<[1], [0], [0], [1], [0, 0, 1, 1], [], []>} : vector<8x8xbf16>, vector<8x32xbf16>, vector<8x32xf32> -> vector<8x32xf32>
    %39 = arith.addf %11, %38 : vector<8x32xf32>
    %c0_25 = arith.constant 0 : index
    %c8 = arith.constant 8 : index
    %40 = vector.load %arg16[%c0_25, %c8] : memref<8x96xf32, #tpu.memory_space<vmem>>, vector<8x8xf32>
    %41 = arith.truncf %40 : vector<8x8xf32> to vector<8x8xbf16>
    %c0_26 = arith.constant 0 : index
    %c40 = arith.constant 40 : index
    %42 = vector.load %arg16[%c0_26, %c40] : memref<8x96xf32, #tpu.memory_space<vmem>>, vector<8x8xf32>
    %43 = arith.truncf %42 : vector<8x8xf32> to vector<8x8xbf16>
    %c0_27 = arith.constant 0 : index
    %c72 = arith.constant 72 : index
    %44 = vector.load %arg16[%c0_27, %c72] : memref<8x96xf32, #tpu.memory_space<vmem>>, vector<8x8xf32>
    %45 = arith.truncf %44 : vector<8x8xf32> to vector<8x8xbf16>
    %cst_28 = arith.constant dense<0.000000e+00> : vector<8x8xf32>
    %46 = tpu.matmul %41, %43, %cst_28 {dimension_numbers = #tpu.dot_dimension_numbers<[1], [1], [0], [0], [0, 0, 1, 0], [], []>} : vector<8x8xbf16>, vector<8x8xbf16>, vector<8x8xf32> -> vector<8x8xf32>
    %cst_29 = arith.constant 0.353553385 : f32
    %47 = vector.broadcast %cst_29 : f32 to vector<8x8xf32>
    %48 = arith.mulf %46, %47 : vector<8x8xf32>
    %49 = vector.broadcast %3 : vector<1x8xf32> to vector<8x8xf32>
    %50 = arith.addf %48, %49 : vector<8x8xf32>
    %cst_30 = arith.constant dense<0xFF800000> : vector<8xf32>
    %51 = vector.multi_reduction <maximumf>, %50, %cst_30 [1] : vector<8x8xf32> to vector<8xf32>
    %52 = vector.shape_cast %51 : vector<8xf32> to vector<8x1xf32>
    %53 = vector.broadcast %52 : vector<8x1xf32> to vector<8x8xf32>
    %54 = arith.subf %50, %53 : vector<8x8xf32>
    %55 = math.exp %54 : vector<8x8xf32>
    %cst_31 = arith.constant dense<0.000000e+00> : vector<8xf32>
    %56 = vector.multi_reduction <add>, %55, %cst_31 [1] : vector<8x8xf32> to vector<8xf32>
    %57 = vector.shape_cast %56 : vector<8xf32> to vector<8x1xf32>
    %58 = tpu.reciprocal %57 {approx = true} : vector<8x1xf32> -> vector<8x1xf32>
    %59 = vector.broadcast %58 : vector<8x1xf32> to vector<8x8xf32>
    %60 = arith.mulf %55, %59 : vector<8x8xf32>
    %61 = arith.truncf %60 : vector<8x8xf32> to vector<8x8xbf16>
    %cst_32 = arith.constant dense<0.000000e+00> : vector<8x8xf32>
    %62 = tpu.matmul %61, %45, %cst_32 {dimension_numbers = #tpu.dot_dimension_numbers<[1], [0], [0], [1], [0, 0, 1, 1], [], []>} : vector<8x8xbf16>, vector<8x8xbf16>, vector<8x8xf32> -> vector<8x8xf32>
    %63 = arith.truncf %62 : vector<8x8xf32> to vector<8x8xbf16>
    %c1 = arith.constant 1 : index
    %c0_33 = arith.constant 0 : index
    %c0_34 = arith.constant 0 : index
    %64 = vector.load %arg5[%c1, %c0_33, %c0_34] : memref<4x8x32xbf16, #tpu.memory_space<vmem>>, vector<1x8x32xbf16>
    %65 = vector.shape_cast %64 : vector<1x8x32xbf16> to vector<8x32xbf16>
    %cst_35 = arith.constant dense<0.000000e+00> : vector<8x32xf32>
    %66 = tpu.matmul %63, %65, %cst_35 {dimension_numbers = #tpu.dot_dimension_numbers<[1], [0], [0], [1], [0, 0, 1, 1], [], []>} : vector<8x8xbf16>, vector<8x32xbf16>, vector<8x32xf32> -> vector<8x32xf32>
    %67 = arith.addf %39, %66 : vector<8x32xf32>
    %c0_36 = arith.constant 0 : index
    %c16 = arith.constant 16 : index
    %68 = vector.load %arg16[%c0_36, %c16] : memref<8x96xf32, #tpu.memory_space<vmem>>, vector<8x8xf32>
    %69 = arith.truncf %68 : vector<8x8xf32> to vector<8x8xbf16>
    %c0_37 = arith.constant 0 : index
    %c48 = arith.constant 48 : index
    %70 = vector.load %arg16[%c0_37, %c48] : memref<8x96xf32, #tpu.memory_space<vmem>>, vector<8x8xf32>
    %71 = arith.truncf %70 : vector<8x8xf32> to vector<8x8xbf16>
    %c0_38 = arith.constant 0 : index
    %c80 = arith.constant 80 : index
    %72 = vector.load %arg16[%c0_38, %c80] : memref<8x96xf32, #tpu.memory_space<vmem>>, vector<8x8xf32>
    %73 = arith.truncf %72 : vector<8x8xf32> to vector<8x8xbf16>
    %cst_39 = arith.constant dense<0.000000e+00> : vector<8x8xf32>
    %74 = tpu.matmul %69, %71, %cst_39 {dimension_numbers = #tpu.dot_dimension_numbers<[1], [1], [0], [0], [0, 0, 1, 0], [], []>} : vector<8x8xbf16>, vector<8x8xbf16>, vector<8x8xf32> -> vector<8x8xf32>
    %cst_40 = arith.constant 0.353553385 : f32
    %75 = vector.broadcast %cst_40 : f32 to vector<8x8xf32>
    %76 = arith.mulf %74, %75 : vector<8x8xf32>
    %77 = vector.broadcast %3 : vector<1x8xf32> to vector<8x8xf32>
    %78 = arith.addf %76, %77 : vector<8x8xf32>
    %cst_41 = arith.constant dense<0xFF800000> : vector<8xf32>
    %79 = vector.multi_reduction <maximumf>, %78, %cst_41 [1] : vector<8x8xf32> to vector<8xf32>
    %80 = vector.shape_cast %79 : vector<8xf32> to vector<8x1xf32>
    %81 = vector.broadcast %80 : vector<8x1xf32> to vector<8x8xf32>
    %82 = arith.subf %78, %81 : vector<8x8xf32>
    %83 = math.exp %82 : vector<8x8xf32>
    %cst_42 = arith.constant dense<0.000000e+00> : vector<8xf32>
    %84 = vector.multi_reduction <add>, %83, %cst_42 [1] : vector<8x8xf32> to vector<8xf32>
    %85 = vector.shape_cast %84 : vector<8xf32> to vector<8x1xf32>
    %86 = tpu.reciprocal %85 {approx = true} : vector<8x1xf32> -> vector<8x1xf32>
    %87 = vector.broadcast %86 : vector<8x1xf32> to vector<8x8xf32>
    %88 = arith.mulf %83, %87 : vector<8x8xf32>
    %89 = arith.truncf %88 : vector<8x8xf32> to vector<8x8xbf16>
    %cst_43 = arith.constant dense<0.000000e+00> : vector<8x8xf32>
    %90 = tpu.matmul %89, %73, %cst_43 {dimension_numbers = #tpu.dot_dimension_numbers<[1], [0], [0], [1], [0, 0, 1, 1], [], []>} : vector<8x8xbf16>, vector<8x8xbf16>, vector<8x8xf32> -> vector<8x8xf32>
    %91 = arith.truncf %90 : vector<8x8xf32> to vector<8x8xbf16>
    %c2 = arith.constant 2 : index
    %c0_44 = arith.constant 0 : index
    %c0_45 = arith.constant 0 : index
    %92 = vector.load %arg5[%c2, %c0_44, %c0_45] : memref<4x8x32xbf16, #tpu.memory_space<vmem>>, vector<1x8x32xbf16>
    %93 = vector.shape_cast %92 : vector<1x8x32xbf16> to vector<8x32xbf16>
    %cst_46 = arith.constant dense<0.000000e+00> : vector<8x32xf32>
    %94 = tpu.matmul %91, %93, %cst_46 {dimension_numbers = #tpu.dot_dimension_numbers<[1], [0], [0], [1], [0, 0, 1, 1], [], []>} : vector<8x8xbf16>, vector<8x32xbf16>, vector<8x32xf32> -> vector<8x32xf32>
    %95 = arith.addf %67, %94 : vector<8x32xf32>
    %c0_47 = arith.constant 0 : index
    %c24 = arith.constant 24 : index
    %96 = vector.load %arg16[%c0_47, %c24] : memref<8x96xf32, #tpu.memory_space<vmem>>, vector<8x8xf32>
    %97 = arith.truncf %96 : vector<8x8xf32> to vector<8x8xbf16>
    %c0_48 = arith.constant 0 : index
    %c56 = arith.constant 56 : index
    %98 = vector.load %arg16[%c0_48, %c56] : memref<8x96xf32, #tpu.memory_space<vmem>>, vector<8x8xf32>
    %99 = arith.truncf %98 : vector<8x8xf32> to vector<8x8xbf16>
    %c0_49 = arith.constant 0 : index
    %c88 = arith.constant 88 : index
    %100 = vector.load %arg16[%c0_49, %c88] : memref<8x96xf32, #tpu.memory_space<vmem>>, vector<8x8xf32>
    %101 = arith.truncf %100 : vector<8x8xf32> to vector<8x8xbf16>
    %cst_50 = arith.constant dense<0.000000e+00> : vector<8x8xf32>
    %102 = tpu.matmul %97, %99, %cst_50 {dimension_numbers = #tpu.dot_dimension_numbers<[1], [1], [0], [0], [0, 0, 1, 0], [], []>} : vector<8x8xbf16>, vector<8x8xbf16>, vector<8x8xf32> -> vector<8x8xf32>
    %cst_51 = arith.constant 0.353553385 : f32
    %103 = vector.broadcast %cst_51 : f32 to vector<8x8xf32>
    %104 = arith.mulf %102, %103 : vector<8x8xf32>
    %105 = vector.broadcast %3 : vector<1x8xf32> to vector<8x8xf32>
    %106 = arith.addf %104, %105 : vector<8x8xf32>
    %cst_52 = arith.constant dense<0xFF800000> : vector<8xf32>
    %107 = vector.multi_reduction <maximumf>, %106, %cst_52 [1] : vector<8x8xf32> to vector<8xf32>
    %108 = vector.shape_cast %107 : vector<8xf32> to vector<8x1xf32>
    %109 = vector.broadcast %108 : vector<8x1xf32> to vector<8x8xf32>
    %110 = arith.subf %106, %109 : vector<8x8xf32>
    %111 = math.exp %110 : vector<8x8xf32>
    %cst_53 = arith.constant dense<0.000000e+00> : vector<8xf32>
    %112 = vector.multi_reduction <add>, %111, %cst_53 [1] : vector<8x8xf32> to vector<8xf32>
    %113 = vector.shape_cast %112 : vector<8xf32> to vector<8x1xf32>
    %114 = tpu.reciprocal %113 {approx = true} : vector<8x1xf32> -> vector<8x1xf32>
    %115 = vector.broadcast %114 : vector<8x1xf32> to vector<8x8xf32>
    %116 = arith.mulf %111, %115 : vector<8x8xf32>
    %117 = arith.truncf %116 : vector<8x8xf32> to vector<8x8xbf16>
    %cst_54 = arith.constant dense<0.000000e+00> : vector<8x8xf32>
    %118 = tpu.matmul %117, %101, %cst_54 {dimension_numbers = #tpu.dot_dimension_numbers<[1], [0], [0], [1], [0, 0, 1, 1], [], []>} : vector<8x8xbf16>, vector<8x8xbf16>, vector<8x8xf32> -> vector<8x8xf32>
    %119 = arith.truncf %118 : vector<8x8xf32> to vector<8x8xbf16>
    %c3 = arith.constant 3 : index
    %c0_55 = arith.constant 0 : index
    %c0_56 = arith.constant 0 : index
    %120 = vector.load %arg5[%c3, %c0_55, %c0_56] : memref<4x8x32xbf16, #tpu.memory_space<vmem>>, vector<1x8x32xbf16>
    %121 = vector.shape_cast %120 : vector<1x8x32xbf16> to vector<8x32xbf16>
    %cst_57 = arith.constant dense<0.000000e+00> : vector<8x32xf32>
    %122 = tpu.matmul %119, %121, %cst_57 {dimension_numbers = #tpu.dot_dimension_numbers<[1], [0], [0], [1], [0, 0, 1, 1], [], []>} : vector<8x8xbf16>, vector<8x32xbf16>, vector<8x32xf32> -> vector<8x32xf32>
    %123 = arith.addf %95, %122 : vector<8x32xf32>
    %c0_58 = arith.constant 0 : index
    %c0_59 = arith.constant 0 : index
    %124 = vector.load %arg6[%c0_58, %c0_59] : memref<1x32xf32, #tpu.memory_space<vmem>>, vector<1x32xf32>
    %125 = vector.broadcast %124 : vector<1x32xf32> to vector<8x32xf32>
    %126 = arith.addf %123, %125 : vector<8x32xf32>
    %127 = arith.addf %126, %1 : vector<8x32xf32>
    %c0_60 = arith.constant 0 : index
    %c0_61 = arith.constant 0 : index
    %128 = vector.load %arg7[%c0_60, %c0_61] : memref<1x32xf32, #tpu.memory_space<vmem>>, vector<1x32xf32>
    %c0_62 = arith.constant 0 : index
    %c0_63 = arith.constant 0 : index
    %129 = vector.load %arg8[%c0_62, %c0_63] : memref<1x32xf32, #tpu.memory_space<vmem>>, vector<1x32xf32>
    %cst_64 = arith.constant dense<0.000000e+00> : vector<8xf32>
    %130 = vector.multi_reduction <add>, %127, %cst_64 [1] : vector<8x32xf32> to vector<8xf32>
    %131 = vector.shape_cast %130 : vector<8xf32> to vector<8x1xf32>
    %cst_65 = arith.constant 3.200000e+01 : f32
    %132 = vector.broadcast %cst_65 : f32 to vector<8x1xf32>
    %133 = arith.divf %131, %132 : vector<8x1xf32>
    %134 = vector.broadcast %133 : vector<8x1xf32> to vector<8x32xf32>
    %135 = arith.subf %127, %134 : vector<8x32xf32>
    %136 = arith.mulf %135, %135 : vector<8x32xf32>
    %cst_66 = arith.constant dense<0.000000e+00> : vector<8xf32>
    %137 = vector.multi_reduction <add>, %136, %cst_66 [1] : vector<8x32xf32> to vector<8xf32>
    %138 = vector.shape_cast %137 : vector<8xf32> to vector<8x1xf32>
    %cst_67 = arith.constant 3.200000e+01 : f32
    %139 = vector.broadcast %cst_67 : f32 to vector<8x1xf32>
    %140 = arith.divf %138, %139 : vector<8x1xf32>
    %cst_68 = arith.constant 9.99999996E-13 : f32
    %141 = vector.broadcast %cst_68 : f32 to vector<8x1xf32>
    %142 = arith.addf %140, %141 : vector<8x1xf32>
    %143 = math.rsqrt %142 : vector<8x1xf32>
    %144 = vector.broadcast %143 : vector<8x1xf32> to vector<8x32xf32>
    %145 = arith.mulf %135, %144 : vector<8x32xf32>
    %146 = vector.broadcast %128 : vector<1x32xf32> to vector<8x32xf32>
    %147 = arith.mulf %145, %146 : vector<8x32xf32>
    %148 = vector.broadcast %129 : vector<1x32xf32> to vector<8x32xf32>
    %149 = arith.addf %147, %148 : vector<8x32xf32>
    %150 = arith.truncf %149 : vector<8x32xf32> to vector<8x32xbf16>
    %c0_69 = arith.constant 0 : index
    %c0_70 = arith.constant 0 : index
    %151 = vector.load %arg9[%c0_69, %c0_70] : memref<32x64xbf16, #tpu.memory_space<vmem>>, vector<32x64xbf16>
    %cst_71 = arith.constant dense<0.000000e+00> : vector<8x64xf32>
    %152 = tpu.matmul %150, %151, %cst_71 {dimension_numbers = #tpu.dot_dimension_numbers<[1], [0], [0], [1], [0, 0, 1, 1], [], []>} : vector<8x32xbf16>, vector<32x64xbf16>, vector<8x64xf32> -> vector<8x64xf32>
    %c0_72 = arith.constant 0 : index
    %c0_73 = arith.constant 0 : index
    %153 = vector.load %arg10[%c0_72, %c0_73] : memref<1x64xf32, #tpu.memory_space<vmem>>, vector<1x64xf32>
    %154 = vector.broadcast %153 : vector<1x64xf32> to vector<8x64xf32>
    %155 = arith.addf %152, %154 : vector<8x64xf32>
    %cst_74 = arith.constant 5.000000e-01 : f32
    %156 = vector.broadcast %cst_74 : f32 to vector<8x64xf32>
    %157 = arith.mulf %156, %155 : vector<8x64xf32>
    %cst_75 = arith.constant 4.471500e-02 : f32
    %158 = vector.broadcast %cst_75 : f32 to vector<8x64xf32>
    %159 = arith.mulf %158, %155 : vector<8x64xf32>
    %160 = arith.mulf %159, %155 : vector<8x64xf32>
    %161 = arith.mulf %160, %155 : vector<8x64xf32>
    %162 = arith.addf %155, %161 : vector<8x64xf32>
    %cst_76 = arith.constant 0.797884583 : f32
    %163 = vector.broadcast %cst_76 : f32 to vector<8x64xf32>
    %164 = arith.mulf %163, %162 : vector<8x64xf32>
    %165 = math.tanh %164 : vector<8x64xf32>
    %cst_77 = arith.constant 1.000000e+00 : f32
    %166 = vector.broadcast %cst_77 : f32 to vector<8x64xf32>
    %167 = arith.addf %166, %165 : vector<8x64xf32>
    %168 = arith.mulf %157, %167 : vector<8x64xf32>
    %169 = arith.truncf %168 : vector<8x64xf32> to vector<8x64xbf16>
    %c0_78 = arith.constant 0 : index
    %c0_79 = arith.constant 0 : index
    %170 = vector.load %arg11[%c0_78, %c0_79] : memref<64x32xbf16, #tpu.memory_space<vmem>>, vector<64x32xbf16>
    %cst_80 = arith.constant dense<0.000000e+00> : vector<8x32xf32>
    %171 = tpu.matmul %169, %170, %cst_80 {dimension_numbers = #tpu.dot_dimension_numbers<[1], [0], [0], [1], [0, 0, 1, 1], [], []>} : vector<8x64xbf16>, vector<64x32xbf16>, vector<8x32xf32> -> vector<8x32xf32>
    %c0_81 = arith.constant 0 : index
    %c0_82 = arith.constant 0 : index
    %172 = vector.load %arg12[%c0_81, %c0_82] : memref<1x32xf32, #tpu.memory_space<vmem>>, vector<1x32xf32>
    %173 = vector.broadcast %172 : vector<1x32xf32> to vector<8x32xf32>
    %174 = arith.addf %171, %173 : vector<8x32xf32>
    %175 = arith.addf %174, %149 : vector<8x32xf32>
    %c0_83 = arith.constant 0 : index
    %c0_84 = arith.constant 0 : index
    %176 = vector.load %arg13[%c0_83, %c0_84] : memref<1x32xf32, #tpu.memory_space<vmem>>, vector<1x32xf32>
    %c0_85 = arith.constant 0 : index
    %c0_86 = arith.constant 0 : index
    %177 = vector.load %arg14[%c0_85, %c0_86] : memref<1x32xf32, #tpu.memory_space<vmem>>, vector<1x32xf32>
    %cst_87 = arith.constant dense<0.000000e+00> : vector<8xf32>
    %178 = vector.multi_reduction <add>, %175, %cst_87 [1] : vector<8x32xf32> to vector<8xf32>
    %179 = vector.shape_cast %178 : vector<8xf32> to vector<8x1xf32>
    %cst_88 = arith.constant 3.200000e+01 : f32
    %180 = vector.broadcast %cst_88 : f32 to vector<8x1xf32>
    %181 = arith.divf %179, %180 : vector<8x1xf32>
    %182 = vector.broadcast %181 : vector<8x1xf32> to vector<8x32xf32>
    %183 = arith.subf %175, %182 : vector<8x32xf32>
    %184 = arith.mulf %183, %183 : vector<8x32xf32>
    %cst_89 = arith.constant dense<0.000000e+00> : vector<8xf32>
    %185 = vector.multi_reduction <add>, %184, %cst_89 [1] : vector<8x32xf32> to vector<8xf32>
    %186 = vector.shape_cast %185 : vector<8xf32> to vector<8x1xf32>
    %cst_90 = arith.constant 3.200000e+01 : f32
    %187 = vector.broadcast %cst_90 : f32 to vector<8x1xf32>
    %188 = arith.divf %186, %187 : vector<8x1xf32>
    %cst_91 = arith.constant 9.99999996E-13 : f32
    %189 = vector.broadcast %cst_91 : f32 to vector<8x1xf32>
    %190 = arith.addf %188, %189 : vector<8x1xf32>
    %191 = math.rsqrt %190 : vector<8x1xf32>
    %192 = vector.broadcast %191 : vector<8x1xf32> to vector<8x32xf32>
    %193 = arith.mulf %183, %192 : vector<8x32xf32>
    %194 = vector.broadcast %176 : vector<1x32xf32> to vector<8x32xf32>
    %195 = arith.mulf %193, %194 : vector<8x32xf32>
    %196 = vector.broadcast %177 : vector<1x32xf32> to vector<8x32xf32>
    %197 = arith.addf %195, %196 : vector<8x32xf32>
    %c0_92 = arith.constant 0 : index
    %c0_93 = arith.constant 0 : index
    %c0_94 = arith.constant 0 : index
    %198 = vector.load %arg15[%c0_92, %c0_93, %c0_94] : memref<1x8x32xf32, #tpu.memory_space<vmem>>, vector<1x8x32xf32>
    %199 = vector.shape_cast %198 : vector<1x8x32xf32> to vector<8x32xf32>
    %200 = vector.shape_cast %197 : vector<8x32xf32> to vector<1x8x32xf32>
    tpu.vector_store %arg15[%c0_92, %c0_93, %c0_94], %200 {strides = array<i32>} : memref<1x8x32xf32, #tpu.memory_space<vmem>>, vector<1x8x32xf32>,
    return
  }
  func.func @transform_0(%arg0: i32) -> (i32, i32, i32) {
    %c0_i32 = arith.constant 0 : i32
    %c0_i32_0 = arith.constant 0 : i32
    %c0_i32_1 = arith.constant 0 : i32
    return %arg0, %c0_i32, %c0_i32_0 : i32, i32, i32
  }
  func.func @transform_1(%arg0: i32) -> (i32, i32, i32) {
    %c0_i32 = arith.constant 0 : i32
    %c0_i32_0 = arith.constant 0 : i32
    %c0_i32_1 = arith.constant 0 : i32
    return %arg0, %c0_i32, %c0_i32_0 : i32, i32, i32
  }
  func.func @transform_2(%arg0: i32) -> (i32, i32) {
    %c0_i32 = arith.constant 0 : i32
    %c0_i32_0 = arith.constant 0 : i32
    %c0_i32_1 = arith.constant 0 : i32
    return %c0_i32, %c0_i32_0 : i32, i32
  }
  func.func @transform_3(%arg0: i32) -> (i32, i32) {
    %c0_i32 = arith.constant 0 : i32
    %c0_i32_0 = arith.constant 0 : i32
    %c0_i32_1 = arith.constant 0 : i32
    return %c0_i32, %c0_i32_0 : i32, i32
  }
  func.func @transform_4(%arg0: i32) -> (i32, i32, i32) {
    %c0_i32 = arith.constant 0 : i32
    %c0_i32_0 = arith.constant 0 : i32
    %c0_i32_1 = arith.constant 0 : i32
    %c0_i32_2 = arith.constant 0 : i32
    return %c0_i32, %c0_i32_0, %c0_i32_1 : i32, i32, i32
  }
  func.func @transform_5(%arg0: i32) -> (i32, i32) {
    %c0_i32 = arith.constant 0 : i32
    %c0_i32_0 = arith.constant 0 : i32
    %c0_i32_1 = arith.constant 0 : i32
    return %c0_i32, %c0_i32_0 : i32, i32
  }
  func.func @transform_6(%arg0: i32) -> (i32, i32) {
    %c0_i32 = arith.constant 0 : i32
    %c0_i32_0 = arith.constant 0 : i32
    %c0_i32_1 = arith.constant 0 : i32
    return %c0_i32, %c0_i32_0 : i32, i32
  }
  func.func @transform_7(%arg0: i32) -> (i32, i32) {
    %c0_i32 = arith.constant 0 : i32
    %c0_i32_0 = arith.constant 0 : i32
    %c0_i32_1 = arith.constant 0 : i32
    return %c0_i32, %c0_i32_0 : i32, i32
  }
  func.func @transform_8(%arg0: i32) -> (i32, i32) {
    %c0_i32 = arith.constant 0 : i32
    %c0_i32_0 = arith.constant 0 : i32
    %c0_i32_1 = arith.constant 0 : i32
    return %c0_i32, %c0_i32_0 : i32, i32
  }
  func.func @transform_9(%arg0: i32) -> (i32, i32) {
    %c0_i32 = arith.constant 0 : i32
    %c0_i32_0 = arith.constant 0 : i32
    %c0_i32_1 = arith.constant 0 : i32
    return %c0_i32, %c0_i32_0 : i32, i32
  }
  func.func @transform_10(%arg0: i32) -> (i32, i32) {
    %c0_i32 = arith.constant 0 : i32
    %c0_i32_0 = arith.constant 0 : i32
    %c0_i32_1 = arith.constant 0 : i32
    return %c0_i32, %c0_i32_0 : i32, i32
  }
  func.func @transform_11(%arg0: i32) -> (i32, i32) {
    %c0_i32 = arith.constant 0 : i32
    %c0_i32_0 = arith.constant 0 : i32
    %c0_i32_1 = arith.constant 0 : i32
    return %c0_i32, %c0_i32_0 : i32, i32
  }
  func.func @transform_12(%arg0: i32) -> (i32, i32) {
    %c0_i32 = arith.constant 0 : i32
    %c0_i32_0 = arith.constant 0 : i32
    %c0_i32_1 = arith.constant 0 : i32
    return %c0_i32, %c0_i32_0 : i32, i32
  }
  func.func @transform_13(%arg0: i32) -> (i32, i32) {
    %c0_i32 = arith.constant 0 : i32
    %c0_i32_0 = arith.constant 0 : i32
    %c0_i32_1 = arith.constant 0 : i32
    return %c0_i32, %c0_i32_0 : i32, i32
  }
  func.func @transform_14(%arg0: i32) -> (i32, i32, i32) {
    %c0_i32 = arith.constant 0 : i32
    %c0_i32_0 = arith.constant 0 : i32
    %c0_i32_1 = arith.constant 0 : i32
    return %arg0, %c0_i32, %c0_i32_0 : i32, i32, i32
  }
}

module attributes {stable_mosaic.version = 11 : i64} {
  func.func @_bert_layer_kernel(%arg0: i32, %arg1: memref<1x8x32xf32, #tpu.memory_space<vmem>>, %arg2: memref<1x1x8xf32, #tpu.memory_space<vmem>>, %arg3: memref<32x96xbf16, #tpu.memory_space<vmem>>, %arg4: memref<1x96xf32, #tpu.memory_space<vmem>>, %arg5: memref<4x8x32xbf16, #tpu.memory_space<vmem>>, %arg6: memref<1x32xf32, #tpu.memory_space<vmem>>, %arg7: memref<1x32xf32, #tpu.memory_space<vmem>>, %arg8: memref<1x32xf32, #tpu.memory_space<vmem>>, %arg9: memref<32x64xbf16, #tpu.memory_space<vmem>>, %arg10: memref<1x64xf32, #tpu.memory_space<vmem>>, %arg11: memref<64x32xbf16, #tpu.memory_space<vmem>>, %arg12: memref<1x32xf32, #tpu.memory_space<vmem>>, %arg13: memref<1x32xf32, #tpu.memory_space<vmem>>, %arg14: memref<1x32xf32, #tpu.memory_space<vmem>>, %arg15: memref<1x8x32xf32, #tpu.memory_space<vmem>>, %arg16: memref<8x96xf32, #tpu.memory_space<vmem>>) attributes {dimension_semantics = [#tpu.dimension_semantics<parallel>], iteration_bounds = array<i64: 2>, scalar_prefetch = 0 : i64, scratch_operands = 1 : i64, tpu.core_type = #tpu.core_type<tc>, window_params = [{transform_indices = @transform_0, window_bounds = array<i64: 1, 8, 32>}, {transform_indices = @transform_1, window_bounds = array<i64: 1, 1, 8>}, {pipeline_mode = #tpu.pipeline_mode<synchronous>, transform_indices = @transform_2, window_bounds = array<i64: 32, 96>}, {pipeline_mode = #tpu.pipeline_mode<synchronous>, transform_indices = @transform_3, window_bounds = array<i64: 1, 96>}, {pipeline_mode = #tpu.pipeline_mode<synchronous>, transform_indices = @transform_4, window_bounds = array<i64: 4, 8, 32>}, {pipeline_mode = #tpu.pipeline_mode<synchronous>, transform_indices = @transform_5, window_bounds = array<i64: 1, 32>}, {pipeline_mode = #tpu.pipeline_mode<synchronous>, transform_indices = @transform_6, window_bounds = array<i64: 1, 32>}, {pipeline_mode = #tpu.pipeline_mode<synchronous>, transform_indices = @transform_7, window_bounds = array<i64: 1, 32>}, {pipeline_mode = #tpu.pipeline_mode<synchronous>, transform_indices = @transform_8, window_bounds = array<i64: 32, 64>}, {pipeline_mode = #tpu.pipeline_mode<synchronous>, transform_indices = @transform_9, window_bounds = array<i64: 1, 64>}, {pipeline_mode = #tpu.pipeline_mode<synchronous>, transform_indices = @transform_10, window_bounds = array<i64: 64, 32>}, {pipeline_mode = #tpu.pipeline_mode<synchronous>, transform_indices = @transform_11, window_bounds = array<i64: 1, 32>}, {pipeline_mode = #tpu.pipeline_mode<synchronous>, transform_indices = @transform_12, window_bounds = array<i64: 1, 32>}, {pipeline_mode = #tpu.pipeline_mode<synchronous>, transform_indices = @transform_13, window_bounds = array<i64: 1, 32>}, {transform_indices = @transform_14, window_bounds = array<i64: 1, 8, 32>}]} {
    %c0 = arith.constant 0 : index
    %c0_0 = arith.constant 0 : index
    %c0_1 = arith.constant 0 : index
    %0 = vector.load %arg1[%c0, %c0_0, %c0_1] : memref<1x8x32xf32, #tpu.memory_space<vmem>>, vector<1x8x32xf32>
    %1 = vector.shape_cast %0 : vector<1x8x32xf32> to vector<8x32xf32>
    %c0_2 = arith.constant 0 : index
    %c0_3 = arith.constant 0 : index
    %c0_4 = arith.constant 0 : index
    %2 = vector.load %arg2[%c0_2, %c0_3, %c0_4] : memref<1x1x8xf32, #tpu.memory_space<vmem>>, vector<1x1x8xf32>
    %3 = vector.shape_cast %2 : vector<1x1x8xf32> to vector<1x8xf32>
    %4 = arith.truncf %1 : vector<8x32xf32> to vector<8x32xbf16>
    %c0_5 = arith.constant 0 : index
    %c0_6 = arith.constant 0 : index
    %5 = vector.load %arg3[%c0_5, %c0_6] : memref<32x96xbf16, #tpu.memory_space<vmem>>, vector<32x96xbf16>
    %cst = arith.constant dense<0.000000e+00> : vector<8x96xf32>
    %6 = tpu.matmul %4, %5, %cst {dimension_numbers = #tpu.dot_dimension_numbers<[1], [0], [0], [1], [0, 0, 1, 1], [], []>} : vector<8x32xbf16>, vector<32x96xbf16>, vector<8x96xf32> -> vector<8x96xf32>
    %c0_7 = arith.constant 0 : index
    %c0_8 = arith.constant 0 : index
    %7 = vector.load %arg4[%c0_7, %c0_8] : memref<1x96xf32, #tpu.memory_space<vmem>>, vector<1x96xf32>
    %8 = vector.broadcast %7 : vector<1x96xf32> to vector<8x96xf32>
    %9 = arith.addf %6, %8 : vector<8x96xf32>
    %c0_9 = arith.constant 0 : index
    %c0_10 = arith.constant 0 : index
    %10 = vector.load %arg16[%c0_9, %c0_10] : memref<8x96xf32, #tpu.memory_space<vmem>>, vector<8x96xf32>
    tpu.vector_store %arg16[%c0_9, %c0_10], %9 {strides = array<i32>} : memref<8x96xf32, #tpu.memory_space<vmem>>, vector<8x96xf32>,
    %cst_11 = arith.constant 0.000000e+00 : f32
    %11 = vector.broadcast %cst_11 : f32 to vector<8x32xf32>
    %c0_12 = arith.constant 0 : index
    %c0_13 = arith.constant 0 : index
    %12 = vector.load %arg16[%c0_12, %c0_13] : memref<8x96xf32, #tpu.memory_space<vmem>>, vector<8x8xf32>
    %13 = arith.truncf %12 : vector<8x8xf32> to vector<8x8xbf16>
    %c0_14 = arith.constant 0 : index
    %c32 = arith.constant 32 : index
    %14 = vector.load %arg16[%c0_14, %c32] : memref<8x96xf32, #tpu.memory_space<vmem>>, vector<8x8xf32>
    %15 = arith.truncf %14 : vector<8x8xf32> to vector<8x8xbf16>
    %c0_15 = arith.constant 0 : index
    %c64 = arith.constant 64 : index
    %16 = vector.load %arg16[%c0_15, %c64] : memref<8x96xf32, #tpu.memory_space<vmem>>, vector<8x8xf32>
    %17 = arith.truncf %16 : vector<8x8xf32> to vector<8x8xbf16>
    %cst_16 = arith.constant dense<0.000000e+00> : vector<8x8xf32>
    %18 = tpu.matmul %13, %15, %cst_16 {dimension_numbers = #tpu.dot_dimension_numbers<[1], [1], [0], [0], [0, 0, 1, 0], [], []>} : vector<8x8xbf16>, vector<8x8xbf16>, vector<8x8xf32> -> vector<8x8xf32>
    %cst_17 = arith.constant 0.353553385 : f32
    %19 = vector.broadcast %cst_17 : f32 to vector<8x8xf32>
    %20 = arith.mulf %18, %19 : vector<8x8xf32>
    %21 = vector.broadcast %3 : vector<1x8xf32> to vector<8x8xf32>
    %22 = arith.addf %20, %21 : vector<8x8xf32>
    %cst_18 = arith.constant dense<0xFF800000> : vector<8xf32>
    %23 = vector.multi_reduction <maximumf>, %22, %cst_18 [1] : vector<8x8xf32> to vector<8xf32>
    %24 = vector.shape_cast %23 : vector<8xf32> to vector<8x1xf32>
    %25 = vector.broadcast %24 : vector<8x1xf32> to vector<8x8xf32>
    %26 = arith.subf %22, %25 : vector<8x8xf32>
    %27 = math.exp %26 : vector<8x8xf32>
    %cst_19 = arith.constant dense<0.000000e+00> : vector<8xf32>
    %28 = vector.multi_reduction <add>, %27, %cst_19 [1] : vector<8x8xf32> to vector<8xf32>
    %29 = vector.shape_cast %28 : vector<8xf32> to vector<8x1xf32>
    %30 = tpu.reciprocal %29 {approx = true} : vector<8x1xf32> -> vector<8x1xf32>
    %31 = vector.broadcast %30 : vector<8x1xf32> to vector<8x8xf32>
    %32 = arith.mulf %27, %31 : vector<8x8xf32>
    %33 = arith.truncf %32 : vector<8x8xf32> to vector<8x8xbf16>
    %cst_20 = arith.constant dense<0.000000e+00> : vector<8x8xf32>
    %34 = tpu.matmul %33, %17, %cst_20 {dimension_numbers = #tpu.dot_dimension_numbers<[1], [0], [0], [1], [0, 0, 1, 1], [], []>} : vector<8x8xbf16>, vector<8x8xbf16>, vector<8x8xf32> -> vector<8x8xf32>
    %35 = arith.truncf %34 : vector<8x8xf32> to vector<8x8xbf16>
    %c0_21 = arith.constant 0 : index
    %c0_22 = arith.constant 0 : index
    %c0_23 = arith.constant 0 : index
    %36 = vector.load %arg5[%c0_21, %c0_22, %c0_23] : memref<4x8x32xbf16, #tpu.memory_space<vmem>>, vector<1x8x32xbf16>
    %37 = vector.shape_cast %36 : vector<1x8x32xbf16> to vector<8x32xbf16>
    %cst_24 = arith.constant dense<0.000000e+00> : vector<8x32xf32>
    %38 = tpu.matmul %35, %37, %cst_24 {dimension_numbers = #tpu.dot_dimension_numbers<[1], [0], [0], [1], [0, 0, 1, 1], [], []>} : vector<8x8xbf16>, vector<8x32xbf16>, vector<8x32xf32> -> vector<8x32xf32>
    %39 = arith.addf %11, %38 : vector<8x32xf32>
    %c0_25 = arith.constant 0 : index
    %c8 = arith.constant 8 : index
    %40 = vector.load %arg16[%c0_25, %c8] : memref<8x96xf32, #tpu.memory_space<vmem>>, vector<8x8xf32>
    %41 = arith.truncf %40 : vector<8x8xf32> to vector<8x8xbf16>
    %c0_26 = arith.constant 0 : index
    %c40 = arith.constant 40 : index
    %42 = vector.load %arg16[%c0_26, %c40] : memref<8x96xf32, #tpu.memory_space<vmem>>, vector<8x8xf32>
    %43 = arith.truncf %42 : vector<8x8xf32> to vector<8x8xbf16>
    %c0_27 = arith.constant 0 : index
    %c72 = arith.constant 72 : index
    %44 = vector.load %arg16[%c0_27, %c72] : memref<8x96xf32, #tpu.memory_space<vmem>>, vector<8x8xf32>
    %45 = arith.truncf %44 : vector<8x8xf32> to vector<8x8xbf16>
    %cst_28 = arith.constant dense<0.000000e+00> : vector<8x8xf32>
    %46 = tpu.matmul %41, %43, %cst_28 {dimension_numbers = #tpu.dot_dimension_numbers<[1], [1], [0], [0], [0, 0, 1, 0], [], []>} : vector<8x8xbf16>, vector<8x8xbf16>, vector<8x8xf32> -> vector<8x8xf32>
    %cst_29 = arith.constant 0.353553385 : f32
    %47 = vector.broadcast %cst_29 : f32 to vector<8x8xf32>
    %48 = arith.mulf %46, %47 : vector<8x8xf32>
    %49 = vector.broadcast %3 : vector<1x8xf32> to vector<8x8xf32>
    %50 = arith.addf %48, %49 : vector<8x8xf32>
    %cst_30 = arith.constant dense<0xFF800000> : vector<8xf32>
    %51 = vector.multi_reduction <maximumf>, %50, %cst_30 [1] : vector<8x8xf32> to vector<8xf32>
    %52 = vector.shape_cast %51 : vector<8xf32> to vector<8x1xf32>
    %53 = vector.broadcast %52 : vector<8x1xf32> to vector<8x8xf32>
    %54 = arith.subf %50, %53 : vector<8x8xf32>
    %55 = math.exp %54 : vector<8x8xf32>
    %cst_31 = arith.constant dense<0.000000e+00> : vector<8xf32>
    %56 = vector.multi_reduction <add>, %55, %cst_31 [1] : vector<8x8xf32> to vector<8xf32>
    %57 = vector.shape_cast %56 : vector<8xf32> to vector<8x1xf32>
    %58 = tpu.reciprocal %57 {approx = true} : vector<8x1xf32> -> vector<8x1xf32>
    %59 = vector.broadcast %58 : vector<8x1xf32> to vector<8x8xf32>
    %60 = arith.mulf %55, %59 : vector<8x8xf32>
    %61 = arith.truncf %60 : vector<8x8xf32> to vector<8x8xbf16>
    %cst_32 = arith.constant dense<0.000000e+00> : vector<8x8xf32>
    %62 = tpu.matmul %61, %45, %cst_32 {dimension_numbers = #tpu.dot_dimension_numbers<[1], [0], [0], [1], [0, 0, 1, 1], [], []>} : vector<8x8xbf16>, vector<8x8xbf16>, vector<8x8xf32> -> vector<8x8xf32>
    %63 = arith.truncf %62 : vector<8x8xf32> to vector<8x8xbf16>
    %c1 = arith.constant 1 : index
    %c0_33 = arith.constant 0 : index
    %c0_34 = arith.constant 0 : index
    %64 = vector.load %arg5[%c1, %c0_33, %c0_34] : memref<4x8x32xbf16, #tpu.memory_space<vmem>>, vector<1x8x32xbf16>
    %65 = vector.shape_cast %64 : vector<1x8x32xbf16> to vector<8x32xbf16>
    %cst_35 = arith.constant dense<0.000000e+00> : vector<8x32xf32>
    %66 = tpu.matmul %63, %65, %cst_35 {dimension_numbers = #tpu.dot_dimension_numbers<[1], [0], [0], [1], [0, 0, 1, 1], [], []>} : vector<8x8xbf16>, vector<8x32xbf16>, vector<8x32xf32> -> vector<8x32xf32>
    %67 = arith.addf %39, %66 : vector<8x32xf32>
    %c0_36 = arith.constant 0 : index
    %c16 = arith.constant 16 : index
    %68 = vector.load %arg16[%c0_36, %c16] : memref<8x96xf32, #tpu.memory_space<vmem>>, vector<8x8xf32>
    %69 = arith.truncf %68 : vector<8x8xf32> to vector<8x8xbf16>
    %c0_37 = arith.constant 0 : index
    %c48 = arith.constant 48 : index
    %70 = vector.load %arg16[%c0_37, %c48] : memref<8x96xf32, #tpu.memory_space<vmem>>, vector<8x8xf32>
    %71 = arith.truncf %70 : vector<8x8xf32> to vector<8x8xbf16>
    %c0_38 = arith.constant 0 : index
    %c80 = arith.constant 80 : index
    %72 = vector.load %arg16[%c0_38, %c80] : memref<8x96xf32, #tpu.memory_space<vmem>>, vector<8x8xf32>
    %73 = arith.truncf %72 : vector<8x8xf32> to vector<8x8xbf16>
    %cst_39 = arith.constant dense<0.000000e+00> : vector<8x8xf32>
    %74 = tpu.matmul %69, %71, %cst_39 {dimension_numbers = #tpu.dot_dimension_numbers<[1], [1], [0], [0], [0, 0, 1, 0], [], []>} : vector<8x8xbf16>, vector<8x8xbf16>, vector<8x8xf32> -> vector<8x8xf32>
    %cst_40 = arith.constant 0.353553385 : f32
    %75 = vector.broadcast %cst_40 : f32 to vector<8x8xf32>
    %76 = arith.mulf %74, %75 : vector<8x8xf32>
    %77 = vector.broadcast %3 : vector<1x8xf32> to vector<8x8xf32>
    %78 = arith.addf %76, %77 : vector<8x8xf32>
    %cst_41 = arith.constant dense<0xFF800000> : vector<8xf32>
    %79 = vector.multi_reduction <maximumf>, %78, %cst_41 [1] : vector<8x8xf32> to vector<8xf32>
    %80 = vector.shape_cast %79 : vector<8xf32> to vector<8x1xf32>
    %81 = vector.broadcast %80 : vector<8x1xf32> to vector<8x8xf32>
    %82 = arith.subf %78, %81 : vector<8x8xf32>
    %83 = math.exp %82 : vector<8x8xf32>
    %cst_42 = arith.constant dense<0.000000e+00> : vector<8xf32>
    %84 = vector.multi_reduction <add>, %83, %cst_42 [1] : vector<8x8xf32> to vector<8xf32>
    %85 = vector.shape_cast %84 : vector<8xf32> to vector<8x1xf32>
    %86 = tpu.reciprocal %85 {approx = true} : vector<8x1xf32> -> vector<8x1xf32>
    %87 = vector.broadcast %86 : vector<8x1xf32> to vector<8x8xf32>
    %88 = arith.mulf %83, %87 : vector<8x8xf32>
    %89 = arith.truncf %88 : vector<8x8xf32> to vector<8x8xbf16>
    %cst_43 = arith.constant dense<0.000000e+00> : vector<8x8xf32>
    %90 = tpu.matmul %89, %73, %cst_43 {dimension_numbers = #tpu.dot_dimension_numbers<[1], [0], [0], [1], [0, 0, 1, 1], [], []>} : vector<8x8xbf16>, vector<8x8xbf16>, vector<8x8xf32> -> vector<8x8xf32>
    %91 = arith.truncf %90 : vector<8x8xf32> to vector<8x8xbf16>
    %c2 = arith.constant 2 : index
    %c0_44 = arith.constant 0 : index
    %c0_45 = arith.constant 0 : index
    %92 = vector.load %arg5[%c2, %c0_44, %c0_45] : memref<4x8x32xbf16, #tpu.memory_space<vmem>>, vector<1x8x32xbf16>
    %93 = vector.shape_cast %92 : vector<1x8x32xbf16> to vector<8x32xbf16>
    %cst_46 = arith.constant dense<0.000000e+00> : vector<8x32xf32>
    %94 = tpu.matmul %91, %93, %cst_46 {dimension_numbers = #tpu.dot_dimension_numbers<[1], [0], [0], [1], [0, 0, 1, 1], [], []>} : vector<8x8xbf16>, vector<8x32xbf16>, vector<8x32xf32> -> vector<8x32xf32>
    %95 = arith.addf %67, %94 : vector<8x32xf32>
    %c0_47 = arith.constant 0 : index
    %c24 = arith.constant 24 : index
    %96 = vector.load %arg16[%c0_47, %c24] : memref<8x96xf32, #tpu.memory_space<vmem>>, vector<8x8xf32>
    %97 = arith.truncf %96 : vector<8x8xf32> to vector<8x8xbf16>
    %c0_48 = arith.constant 0 : index
    %c56 = arith.constant 56 : index
    %98 = vector.load %arg16[%c0_48, %c56] : memref<8x96xf32, #tpu.memory_space<vmem>>, vector<8x8xf32>
    %99 = arith.truncf %98 : vector<8x8xf32> to vector<8x8xbf16>
    %c0_49 = arith.constant 0 : index
    %c88 = arith.constant 88 : index
    %100 = vector.load %arg16[%c0_49, %c88] : memref<8x96xf32, #tpu.memory_space<vmem>>, vector<8x8xf32>
    %101 = arith.truncf %100 : vector<8x8xf32> to vector<8x8xbf16>
    %cst_50 = arith.constant dense<0.000000e+00> : vector<8x8xf32>
    %102 = tpu.matmul %97, %99, %cst_50 {dimension_numbers = #tpu.dot_dimension_numbers<[1], [1], [0], [0], [0, 0, 1, 0], [], []>} : vector<8x8xbf16>, vector<8x8xbf16>, vector<8x8xf32> -> vector<8x8xf32>
    %cst_51 = arith.constant 0.353553385 : f32
    %103 = vector.broadcast %cst_51 : f32 to vector<8x8xf32>
    %104 = arith.mulf %102, %103 : vector<8x8xf32>
    %105 = vector.broadcast %3 : vector<1x8xf32> to vector<8x8xf32>
    %106 = arith.addf %104, %105 : vector<8x8xf32>
    %cst_52 = arith.constant dense<0xFF800000> : vector<8xf32>
    %107 = vector.multi_reduction <maximumf>, %106, %cst_52 [1] : vector<8x8xf32> to vector<8xf32>
    %108 = vector.shape_cast %107 : vector<8xf32> to vector<8x1xf32>
    %109 = vector.broadcast %108 : vector<8x1xf32> to vector<8x8xf32>
    %110 = arith.subf %106, %109 : vector<8x8xf32>
    %111 = math.exp %110 : vector<8x8xf32>
    %cst_53 = arith.constant dense<0.000000e+00> : vector<8xf32>
    %112 = vector.multi_reduction <add>, %111, %cst_53 [1] : vector<8x8xf32> to vector<8xf32>
    %113 = vector.shape_cast %112 : vector<8xf32> to vector<8x1xf32>
    %114 = tpu.reciprocal %113 {approx = true} : vector<8x1xf32> -> vector<8x1xf32>
    %115 = vector.broadcast %114 : vector<8x1xf32> to vector<8x8xf32>
    %116 = arith.mulf %111, %115 : vector<8x8xf32>
    %117 = arith.truncf %116 : vector<8x8xf32> to vector<8x8xbf16>
    %cst_54 = arith.constant dense<0.000000e+00> : vector<8x8xf32>
    %118 = tpu.matmul %117, %101, %cst_54 {dimension_numbers = #tpu.dot_dimension_numbers<[1], [0], [0], [1], [0, 0, 1, 1], [], []>} : vector<8x8xbf16>, vector<8x8xbf16>, vector<8x8xf32> -> vector<8x8xf32>
    %119 = arith.truncf %118 : vector<8x8xf32> to vector<8x8xbf16>
    %c3 = arith.constant 3 : index
    %c0_55 = arith.constant 0 : index
    %c0_56 = arith.constant 0 : index
    %120 = vector.load %arg5[%c3, %c0_55, %c0_56] : memref<4x8x32xbf16, #tpu.memory_space<vmem>>, vector<1x8x32xbf16>
    %121 = vector.shape_cast %120 : vector<1x8x32xbf16> to vector<8x32xbf16>
    %cst_57 = arith.constant dense<0.000000e+00> : vector<8x32xf32>
    %122 = tpu.matmul %119, %121, %cst_57 {dimension_numbers = #tpu.dot_dimension_numbers<[1], [0], [0], [1], [0, 0, 1, 1], [], []>} : vector<8x8xbf16>, vector<8x32xbf16>, vector<8x32xf32> -> vector<8x32xf32>
    %123 = arith.addf %95, %122 : vector<8x32xf32>
    %c0_58 = arith.constant 0 : index
    %c0_59 = arith.constant 0 : index
    %124 = vector.load %arg6[%c0_58, %c0_59] : memref<1x32xf32, #tpu.memory_space<vmem>>, vector<1x32xf32>
    %125 = vector.broadcast %124 : vector<1x32xf32> to vector<8x32xf32>
    %126 = arith.addf %123, %125 : vector<8x32xf32>
    %127 = arith.addf %126, %1 : vector<8x32xf32>
    %c0_60 = arith.constant 0 : index
    %c0_61 = arith.constant 0 : index
    %128 = vector.load %arg7[%c0_60, %c0_61] : memref<1x32xf32, #tpu.memory_space<vmem>>, vector<1x32xf32>
    %c0_62 = arith.constant 0 : index
    %c0_63 = arith.constant 0 : index
    %129 = vector.load %arg8[%c0_62, %c0_63] : memref<1x32xf32, #tpu.memory_space<vmem>>, vector<1x32xf32>
    %cst_64 = arith.constant dense<0.000000e+00> : vector<8xf32>
    %130 = vector.multi_reduction <add>, %127, %cst_64 [1] : vector<8x32xf32> to vector<8xf32>
    %131 = vector.shape_cast %130 : vector<8xf32> to vector<8x1xf32>
    %cst_65 = arith.constant 3.200000e+01 : f32
    %132 = vector.broadcast %cst_65 : f32 to vector<8x1xf32>
    %133 = arith.divf %131, %132 : vector<8x1xf32>
    %134 = vector.broadcast %133 : vector<8x1xf32> to vector<8x32xf32>
    %135 = arith.subf %127, %134 : vector<8x32xf32>
    %136 = arith.mulf %135, %135 : vector<8x32xf32>
    %cst_66 = arith.constant dense<0.000000e+00> : vector<8xf32>
    %137 = vector.multi_reduction <add>, %136, %cst_66 [1] : vector<8x32xf32> to vector<8xf32>
    %138 = vector.shape_cast %137 : vector<8xf32> to vector<8x1xf32>
    %cst_67 = arith.constant 3.200000e+01 : f32
    %139 = vector.broadcast %cst_67 : f32 to vector<8x1xf32>
    %140 = arith.divf %138, %139 : vector<8x1xf32>
    %cst_68 = arith.constant 9.99999996E-13 : f32
    %141 = vector.broadcast %cst_68 : f32 to vector<8x1xf32>
    %142 = arith.addf %140, %141 : vector<8x1xf32>
    %143 = math.rsqrt %142 : vector<8x1xf32>
    %144 = vector.broadcast %143 : vector<8x1xf32> to vector<8x32xf32>
    %145 = arith.mulf %135, %144 : vector<8x32xf32>
    %146 = vector.broadcast %128 : vector<1x32xf32> to vector<8x32xf32>
    %147 = arith.mulf %145, %146 : vector<8x32xf32>
    %148 = vector.broadcast %129 : vector<1x32xf32> to vector<8x32xf32>
    %149 = arith.addf %147, %148 : vector<8x32xf32>
    %150 = arith.truncf %149 : vector<8x32xf32> to vector<8x32xbf16>
    %c0_69 = arith.constant 0 : index
    %c0_70 = arith.constant 0 : index
    %151 = vector.load %arg9[%c0_69, %c0_70] : memref<32x64xbf16, #tpu.memory_space<vmem>>, vector<32x64xbf16>
    %cst_71 = arith.constant dense<0.000000e+00> : vector<8x64xf32>
    %152 = tpu.matmul %150, %151, %cst_71 {dimension_numbers = #tpu.dot_dimension_numbers<[1], [0], [0], [1], [0, 0, 1, 1], [], []>} : vector<8x32xbf16>, vector<32x64xbf16>, vector<8x64xf32> -> vector<8x64xf32>
    %c0_72 = arith.constant 0 : index
    %c0_73 = arith.constant 0 : index
    %153 = vector.load %arg10[%c0_72, %c0_73] : memref<1x64xf32, #tpu.memory_space<vmem>>, vector<1x64xf32>
    %154 = vector.broadcast %153 : vector<1x64xf32> to vector<8x64xf32>
    %155 = arith.addf %152, %154 : vector<8x64xf32>
    %cst_74 = arith.constant 5.000000e-01 : f32
    %156 = vector.broadcast %cst_74 : f32 to vector<8x64xf32>
    %157 = arith.mulf %156, %155 : vector<8x64xf32>
    %cst_75 = arith.constant 4.471500e-02 : f32
    %158 = vector.broadcast %cst_75 : f32 to vector<8x64xf32>
    %159 = arith.mulf %158, %155 : vector<8x64xf32>
    %160 = arith.mulf %159, %155 : vector<8x64xf32>
    %161 = arith.mulf %160, %155 : vector<8x64xf32>
    %162 = arith.addf %155, %161 : vector<8x64xf32>
    %cst_76 = arith.constant 0.797884583 : f32
    %163 = vector.broadcast %cst_76 : f32 to vector<8x64xf32>
    %164 = arith.mulf %163, %162 : vector<8x64xf32>
    %165 = math.tanh %164 : vector<8x64xf32>
    %cst_77 = arith.constant 1.000000e+00 : f32
    %166 = vector.broadcast %cst_77 : f32 to vector<8x64xf32>
    %167 = arith.addf %166, %165 : vector<8x64xf32>
    %168 = arith.mulf %157, %167 : vector<8x64xf32>
    %169 = arith.truncf %168 : vector<8x64xf32> to vector<8x64xbf16>
    %c0_78 = arith.constant 0 : index
    %c0_79 = arith.constant 0 : index
    %170 = vector.load %arg11[%c0_78, %c0_79] : memref<64x32xbf16, #tpu.memory_space<vmem>>, vector<64x32xbf16>
    %cst_80 = arith.constant dense<0.000000e+00> : vector<8x32xf32>
    %171 = tpu.matmul %169, %170, %cst_80 {dimension_numbers = #tpu.dot_dimension_numbers<[1], [0], [0], [1], [0, 0, 1, 1], [], []>} : vector<8x64xbf16>, vector<64x32xbf16>, vector<8x32xf32> -> vector<8x32xf32>
    %c0_81 = arith.constant 0 : index
    %c0_82 = arith.constant 0 : index
    %172 = vector.load %arg12[%c0_81, %c0_82] : memref<1x32xf32, #tpu.memory_space<vmem>>, vector<1x32xf32>
    %173 = vector.broadcast %172 : vector<1x32xf32> to vector<8x32xf32>
    %174 = arith.addf %171, %173 : vector<8x32xf32>
    %175 = arith.addf %174, %149 : vector<8x32xf32>
    %c0_83 = arith.constant 0 : index
    %c0_84 = arith.constant 0 : index
    %176 = vector.load %arg13[%c0_83, %c0_84] : memref<1x32xf32, #tpu.memory_space<vmem>>, vector<1x32xf32>
    %c0_85 = arith.constant 0 : index
    %c0_86 = arith.constant 0 : index
    %177 = vector.load %arg14[%c0_85, %c0_86] : memref<1x32xf32, #tpu.memory_space<vmem>>, vector<1x32xf32>
    %cst_87 = arith.constant dense<0.000000e+00> : vector<8xf32>
    %178 = vector.multi_reduction <add>, %175, %cst_87 [1] : vector<8x32xf32> to vector<8xf32>
    %179 = vector.shape_cast %178 : vector<8xf32> to vector<8x1xf32>
    %cst_88 = arith.constant 3.200000e+01 : f32
    %180 = vector.broadcast %cst_88 : f32 to vector<8x1xf32>
    %181 = arith.divf %179, %180 : vector<8x1xf32>
    %182 = vector.broadcast %181 : vector<8x1xf32> to vector<8x32xf32>
    %183 = arith.subf %175, %182 : vector<8x32xf32>
    %184 = arith.mulf %183, %183 : vector<8x32xf32>
    %cst_89 = arith.constant dense<0.000000e+00> : vector<8xf32>
    %185 = vector.multi_reduction <add>, %184, %cst_89 [1] : vector<8x32xf32> to vector<8xf32>
    %186 = vector.shape_cast %185 : vector<8xf32> to vector<8x1xf32>
    %cst_90 = arith.constant 3.200000e+01 : f32
    %187 = vector.broadcast %cst_90 : f32 to vector<8x1xf32>
    %188 = arith.divf %186, %187 : vector<8x1xf32>
    %cst_91 = arith.constant 9.99999996E-13 : f32
    %189 = vector.broadcast %cst_91 : f32 to vector<8x1xf32>
    %190 = arith.addf %188, %189 : vector<8x1xf32>
    %191 = math.rsqrt %190 : vector<8x1xf32>
    %192 = vector.broadcast %191 : vector<8x1xf32> to vector<8x32xf32>
    %193 = arith.mulf %183, %192 : vector<8x32xf32>
    %194 = vector.broadcast %176 : vector<1x32xf32> to vector<8x32xf32>
    %195 = arith.mulf %193, %194 : vector<8x32xf32>
    %196 = vector.broadcast %177 : vector<1x32xf32> to vector<8x32xf32>
    %197 = arith.addf %195, %196 : vector<8x32xf32>
    %c0_92 = arith.constant 0 : index
    %c0_93 = arith.constant 0 : index
    %c0_94 = arith.constant 0 : index
    %198 = vector.load %arg15[%c0_92, %c0_93, %c0_94] : memref<1x8x32xf32, #tpu.memory_space<vmem>>, vector<1x8x32xf32>
    %199 = vector.shape_cast %198 : vector<1x8x32xf32> to vector<8x32xf32>
    %200 = vector.shape_cast %197 : vector<8x32xf32> to vector<1x8x32xf32>
    tpu.vector_store %arg15[%c0_92, %c0_93, %c0_94], %200 {strides = array<i32>} : memref<1x8x32xf32, #tpu.memory_space<vmem>>, vector<1x8x32xf32>,
    return
  }
  func.func @transform_0(%arg0: i32) -> (i32, i32, i32) {
    %c0_i32 = arith.constant 0 : i32
    %c0_i32_0 = arith.constant 0 : i32
    %c0_i32_1 = arith.constant 0 : i32
    return %arg0, %c0_i32, %c0_i32_0 : i32, i32, i32
  }
  func.func @transform_1(%arg0: i32) -> (i32, i32, i32) {
    %c0_i32 = arith.constant 0 : i32
    %c0_i32_0 = arith.constant 0 : i32
    %c0_i32_1 = arith.constant 0 : i32
    return %arg0, %c0_i32, %c0_i32_0 : i32, i32, i32
  }
  func.func @transform_2(%arg0: i32) -> (i32, i32) {
    %c0_i32 = arith.constant 0 : i32
    %c0_i32_0 = arith.constant 0 : i32
    %c0_i32_1 = arith.constant 0 : i32
    return %c0_i32, %c0_i32_0 : i32, i32
  }
  func.func @transform_3(%arg0: i32) -> (i32, i32) {
    %c0_i32 = arith.constant 0 : i32
    %c0_i32_0 = arith.constant 0 : i32
    %c0_i32_1 = arith.constant 0 : i32
    return %c0_i32, %c0_i32_0 : i32, i32
  }
  func.func @transform_4(%arg0: i32) -> (i32, i32, i32) {
    %c0_i32 = arith.constant 0 : i32
    %c0_i32_0 = arith.constant 0 : i32
    %c0_i32_1 = arith.constant 0 : i32
    %c0_i32_2 = arith.constant 0 : i32
    return %c0_i32, %c0_i32_0, %c0_i32_1 : i32, i32, i32
  }
  func.func @transform_5(%arg0: i32) -> (i32, i32) {
    %c0_i32 = arith.constant 0 : i32
    %c0_i32_0 = arith.constant 0 : i32
    %c0_i32_1 = arith.constant 0 : i32
    return %c0_i32, %c0_i32_0 : i32, i32
  }
  func.func @transform_6(%arg0: i32) -> (i32, i32) {
    %c0_i32 = arith.constant 0 : i32
    %c0_i32_0 = arith.constant 0 : i32
    %c0_i32_1 = arith.constant 0 : i32
    return %c0_i32, %c0_i32_0 : i32, i32
  }
  func.func @transform_7(%arg0: i32) -> (i32, i32) {
    %c0_i32 = arith.constant 0 : i32
    %c0_i32_0 = arith.constant 0 : i32
    %c0_i32_1 = arith.constant 0 : i32
    return %c0_i32, %c0_i32_0 : i32, i32
  }
  func.func @transform_8(%arg0: i32) -> (i32, i32) {
    %c0_i32 = arith.constant 0 : i32
    %c0_i32_0 = arith.constant 0 : i32
    %c0_i32_1 = arith.constant 0 : i32
    return %c0_i32, %c0_i32_0 : i32, i32
  }
  func.func @transform_9(%arg0: i32) -> (i32, i32) {
    %c0_i32 = arith.constant 0 : i32
    %c0_i32_0 = arith.constant 0 : i32
    %c0_i32_1 = arith.constant 0 : i32
    return %c0_i32, %c0_i32_0 : i32, i32
  }
  func.func @transform_10(%arg0: i32) -> (i32, i32) {
    %c0_i32 = arith.constant 0 : i32
    %c0_i32_0 = arith.constant 0 : i32
    %c0_i32_1 = arith.constant 0 : i32
    return %c0_i32, %c0_i32_0 : i32, i32
  }
  func.func @transform_11(%arg0: i32) -> (i32, i32) {
    %c0_i32 = arith.constant 0 : i32
    %c0_i32_0 = arith.constant 0 : i32
    %c0_i32_1 = arith.constant 0 : i32
    return %c0_i32, %c0_i32_0 : i32, i32
  }
  func.func @transform_12(%arg0: i32) -> (i32, i32) {
    %c0_i32 = arith.constant 0 : i32
    %c0_i32_0 = arith.constant 0 : i32
    %c0_i32_1 = arith.constant 0 : i32
    return %c0_i32, %c0_i32_0 : i32, i32
  }
  func.func @transform_13(%arg0: i32) -> (i32, i32) {
    %c0_i32 = arith.constant 0 : i32
    %c0_i32_0 = arith.constant 0 : i32
    %c0_i32_1 = arith.constant 0 : i32
    return %c0_i32, %c0_i32_0 : i32, i32
  }
  func.func @transform_14(%arg0: i32) -> (i32, i32, i32) {
    %c0_i32 = arith.constant 0 : i32
    %c0_i32_0 = arith.constant 0 : i32
    %c0_i32_1 = arith.constant 0 : i32
    return %arg0, %c0_i32, %c0_i32_0 : i32, i32, i32
  }
}

</mosaic_0001>

<bundles_post_ra>
// kernel: bert_encoder_forward.3
= control target key start
LH: loop header
LB: loop body
LE: loop exit
PB: predicated region body
PF: predicated region fallthrough
CT: control target
= control target key end

     0   :  { %s2200_s0 = inlined_call_operand.vmem [shape: f32[2,8,32], index: 0, kind: input, shape index: {}]   ;;  %s2201_s1 = inlined_call_operand.vmem [shape: f32[2,1,8], index: 1, kind: input, shape index: {}]   ;;  %s2202_s2 = inlined_call_operand.vmem [shape: bf16[32,96], index: 2, kind: input, shape index: {}]   ;;  %s2203_s3 = inlined_call_operand.vmem [shape: f32[1,96], index: 3, kind: input, shape index: {}]   ;;  %s2204_s4 = inlined_call_operand.vmem [shape: bf16[4,8,32], index: 4, kind: input, shape index: {}]   ;;  %s2205_s5 = inlined_call_operand.vmem [shape: f32[1,32], index: 5, kind: input, shape index: {}]   ;;  %s2206_s6 = inlined_call_operand.vmem [shape: f32[1,32], index: 6, kind: input, shape index: {}]   ;;  %s2207_s7 = inlined_call_operand.vmem [shape: f32[1,32], index: 7, kind: input, shape index: {}]   ;;  %s2208_s8 = inlined_call_operand.vmem [shape: bf16[32,64], index: 8, kind: input, shape index: {}]   ;;  %s2209_s9 = inlined_call_operand.vmem [shape: f32[1,64], index: 9, kind: input, shape index: {}]   ;;  %s2210_s10 = inlined_call_operand.vmem [shape: bf16[64,32], index: 10, kind: input, shape index: {}]   ;;  %s2211_s11 = inlined_call_operand.vmem [shape: f32[1,32], index: 11, kind: input, shape index: {}]   ;;  %s2212_s12 = inlined_call_operand.vmem [shape: f32[1,32], index: 12, kind: input, shape index: {}]   ;;  %s2213_s13 = inlined_call_operand.vmem [shape: f32[1,32], index: 13, kind: input, shape index: {}]   ;;  %s2214_s14 = inlined_call_operand.hbm [shape: f32[2,8,32], index: 14, kind: output, shape index: {}]  }
   0x1   :  { %2215 = sst [smem:[#allocation6_spill]] %s2200_s0 }
   0x2   :  { %2216 = sst [smem:[#allocation7_spill]] %s2201_s1 }
   0x3   :  { %2217 = sst [smem:[#allocation8_spill]] %s2202_s2 }
   0x4   :  { %2218 = sst [smem:[#allocation9_spill]] %s2203_s3 }
   0x5   :  { %2219 = sst [smem:[#allocation10_spill]] %s2204_s4 }
   0x6   :  { %2220 = sst [smem:[#allocation11_spill]] %s2205_s5 }
   0x7   :  { %19 = vsyncpa [#allocation4], 0 }
   0x8   :  { %21 = vsyncpa [#allocation4 + $0x1], 0  ;;  %s1929_s29 = smov 0   ;;  %s1931_s30 = smov 0  }
   0x9   :  { %s1933_s15 = smov 0   ;;  %s1935_s16 = smov 0  }
   0xa LB: > { %s1950_s17 = sadd.s32 4294967295, %s1838_s16   ;;  %s1516_s18 = sadd.s32 4294967294, %s1838_s16   ;;  %s1838_s16 = sphi %s1935_s16, %s2232_s16   ;;  %s1834_s15 = sphi %s1933_s15, %s2231_s15   ;;  %s1830_s30 = sphi %s1931_s30, %s2230_s30   ;;  %s1826_s29 = sphi %s1929_s29, %s2229_s29  }
   0xb   : > { %s1954_s19 = sadd.s32 1, %s1838_s16   ;;  %s338_s20 = sadd.s32 1, %s1834_s15 }
   0xc   : > { %s335_s21 = ssub.s32 %s1838_s16, %s1954_s19  ;;  %p348_p0 = scmp.ne.s32.totalorder %s1834_s15, %s1830_s30 }
   0xd   : > { %p336_p1 = scmp.eq.s32.totalorder %s335_s21, 0  ;;  %p349_p2 = scmp.eq.s32.totalorder %s1950_s17, 1 }
   0xe   : > { %p354_p3 = scmp.ne.s32.totalorder %s1830_s30, %s1826_s29  ;;  %p355_p4 = scmp.eq.s32.totalorder %s1516_s18, 1 }
   0xf   : > { %s1965_s22 = scalar_select %p336_p1, %s1834_s15, %s338_s20  }
  0x10   : > { %p1967_p5 = por %p349_p2, %p348_p0  ;;  %p1971_p6 = por %p355_p4, %p354_p3 }
  0x11   : > { %p1519_p7 = scmp.ge.s32.totalorder %s1838_s16, 1  ;;  %p422_p8 = scmp.lt.s32.totalorder %s1838_s16, 3 }
  0x13   : > { %p423_p9 = pnand %p1519_p7, %p422_p8 }
  0x14   : > { %s2223_s2 = sld [smem:[#allocation8_spill]] (!%p423_p9)  ;;  %p470_p10 = scmp.lt.s32.totalorder (!%p423_p9), %s1950_s17, 1 }
  0x15   : > { %426 = sbr.rel (%p423_p9) target bundleno = 3562 (0xdea), region = 76  ;;  %s2224_s0 = sld [smem:[#allocation6_spill]] (!%p423_p9) }
  0x16   : > { %s2225_s3 = sld [smem:[#allocation9_spill]] (!%p423_p9)  ;;  %s1843_s21 = smov (!%p423_p9), 96  }
  0x17   : > { %s1844_s25 = smov (!%p423_p9), 88   ;;  %s2226_s1 = sld [smem:[#allocation7_spill]] (!%p423_p9) }
  0x18   : > { %s2227_s4 = sld [smem:[#allocation10_spill]] (!%p423_p9) }
  0x19   : > { %s2228_s5 = sld [smem:[#allocation11_spill]] (!%p423_p9) }
  0x1a   : > { %v1748_v0 = vld [vmem:[%s2223_s2 + $0x8] sm:$0xff]   ;;  %v1840_v1 = vmov 0.0   ;;  %v1749_v2 = vld [vmem:[%s2223_s2] sm:$0xff]   ;;  %vm1841_vm0 = vmmov 0   ;;  %s1992_s18 = scalar_select %p470_p10, %s1950_s17, 1  ;;  %vm504_vm1 = vcmask 261120  }
  0x1b   : > { %1596 = vmatprep.subr.bf16.mxu1 %v1840_v1  ;;  %1610 = vmatprep.subr.bf16.mxu0 %v1840_v1  ;;  %vm548_vm2 = vcmask 785408   ;;  %vm555_vm3 = vcmask 64512   ;;  %vm627_vm4 = vcmask 1043456   ;;  %vm1359_vm5 = vcmask 523264  }
  0x1c   : > { %1597 = vmatpush3.bf16.msra.mxu1 %v1748_v0  ;;  %1600 = vmatprep.mubr.msk.bf16.mxu1 %vm1841_vm0, %v1840_v1  ;;  %s1521_s20 = sshll.u32 %s1992_s18, 3  ;;  %v1522_v5 = vld [vmem:[%s2225_s3] ss:$0 sm:$0xff] }
  0x1d   : > { %1598 = vmatprep.subr.bf16.mxu1 %v1840_v1  ;;  %1612 = vmatprep.mubr.msk.bf16.mxu0 %vm1841_vm0, %v1840_v1  ;;  %s473_s26 = scalar_lea.vmem %s2224_s0, %s1521_s20  ;;  %s1842_s20 = smov 120  }
  0x1e   : > { %v1999_v3 = vld [vmem:[%s473_s26] sm:$0xff]  ;;  %s476_s28 = scalar_lea.vmem %s2226_s1, %s1992_s18  ;;  %s1845_s18 = smov 64  }
  0x1f   : > { %v480_v4 = vpack.c.bf16 %v1999_v3, %v1999_v3  ;;  %v2029_v19 = vld [vmem:[%s476_s28] ss:$0 sm:$0xff]  ;;  %v1531_v57 = vld [vmem:[%s2227_s4 + $0x4] sm:$0xf]  ;;  %s1852_s28 = smov 40   ;;  %s1853_s26 = smov [#allocation3]  }
  0x20   : > { %1599 = vmatpush3.bf16.msra.mxu1 %v1749_v2  ;;  %v672_v55 = vld [vmem:[%s2227_s4] sm:$0xf]  ;;  %v792_v58 = vsel %vm627_vm4, %v1531_v57, 0  ;;  %s1782_s27 = sshll.u32 %s1853_s26, 4  ;;  %s1783_s27 = int_to_ptr.vmem [resolvable:$false] %s1782_s27 }
  0x21   : > { %1604 = vmatprep.subr.bf16.mxu1 %v1840_v1  ;;  %v838_v56 = vsel %vm627_vm4, %v672_v55, 0 }
  0x23   : > { %1601 = vmatmul.mubr.msk.bf16.vlgmr.msra.gmra.mxu1 %vm504_vm1, %v480_v4 }
  0x24   : > { %1606 = vmatprep.mubr.msk.bf16.mxu1 %vm1841_vm0, %v1840_v1 }
  0xe3   : > { %v542_v6 = vpop.f32.mrf.mxu1 }
  0xe4   : > { %v543_v7 = vadd.f32 %v1522_v5, %v542_v6 }
  0xe5   : > { %v1602_v8 = vpop.f32.mrf.mxu1 }
  0xe6   : > { %549 = vst.msk [vmem:[#allocation2] sm:$0xff] %vm548_vm2, %v543_v7 }
  0xe7   : > { %v545_v9 = vpop.f32.mrf.mxu1 }
  0xe9   : > { %v1603_v10 = vpop.f32.mrf.mxu1 }
  0xed   : > { %v550_v11 = vld [vmem:[#allocation2] sm:$0xff] }
  0xee   : > { %v2009_v12 = vpack.c.bf16 %v550_v11, %v550_v11 }
  0xf0   : > { %673 = vrot.lane.b32.xlu1 %v2009_v12, %s1842_s20  ;;  %553 = vrot.lane.b32.xlu0 %v2009_v12, %s1843_s21  ;;  %s1846_s20 = smov 56   ;;  %s1847_s21 = smov 112  }
  0xf4   : > { %675 = vrot.lane.b32.xlu0 %v2009_v12, %s1844_s25  ;;  %s1848_s25 = smov 80  }
 0x162   : > { %v554_v13 = vpop.permute.xlu0 %553  ;;  %v674_v17 = vpop.permute.xlu1 %673 }
 0x163   : > { %v560_v14 = vsel %vm555_vm3, %v554_v13, 0 }
 0x164   : > { %1605 = vmatpush3.bf16.xpose.msra.mxu1 %v560_v14 }
 0x165   : > { %1616 = vmatprep.subr.bf16.mxu1 %v1840_v1 }
 0x166   : > { %v676_v15 = vpop.permute.xlu0 %675 }
 0x167   : > { %v681_v16 = vsel %vm555_vm3, %v676_v15, 0 }
 0x16b   : > { %1607 = vmatmul.mubr.msk.bf16.vlgmr.msra.gmra.mxu1 %vm555_vm3, %v2009_v12 }
 0x16c   : > { %1617 = vmatpush3.bf16.xpose.msra.mxu1 %v681_v16  ;;  %1618 = vmatprep.mubr.msk.bf16.mxu1 %vm1841_vm0, %v1840_v1 }
 0x16d   : > { %1628 = vmatprep.subr.bf16.mxu1 %v1840_v1 }
 0x173   : > { %1619 = vmatmul.mubr.msk.bf16.vlgmr.msra.gmra.mxu1 %vm555_vm3, %v674_v17 }
 0x174   : > { %1630 = vmatprep.mubr.msk.bf16.mxu1 %vm1841_vm0, %v1840_v1  ;;  %1629 = vmatpush3.bf16.msra.mxu1 %v792_v58 }
 0x175   : > { %1640 = vmatprep.subr.bf16.mxu1 %v1840_v1 }
 0x22b   : > { %v596_v18 = vpop.f32.mrf.mxu1 }
 0x22c   : > { %v602_v20 = vmul.f32 0.35355338, %v596_v18 }
 0x22d   : > { %v1608_v21 = vpop.f32.mrf.mxu1 }
 0x22e   : > { %v609_v22 = vadd.f32 %v2029_v19, %v602_v20 }
 0x22f   : > { %v599_v23 = vpop.f32.mrf.mxu1 }
 0x230   : > { %v610_v24 = vsel %vm555_vm3, %v609_v22, -inf }
 0x231   : > { %611 = vmax.xlane.f32.xlu1 %v610_v24  ;;  %v1609_v25 = vpop.f32.mrf.mxu1 }
 0x233   : > { %v717_v26 = vpop.f32.mrf.mxu1 }
 0x234   : > { %v723_v27 = vmul.f32 0.35355338, %v717_v26 }
 0x235   : > { %v1620_v28 = vpop.f32.mrf.mxu1 }
 0x236   : > { %v724_v29 = vadd.f32 %v2029_v19, %v723_v27 }
 0x237   : > { %v720_v30 = vpop.f32.mrf.mxu1 }
 0x238   : > { %v725_v31 = vsel %vm555_vm3, %v724_v29, -inf }
 0x239   : > { %726 = vmax.xlane.f32.xlu0 %v725_v31  ;;  %v1621_v32 = vpop.f32.mrf.mxu1 }
 0x2ba   : > { %v612_v33 = vpop.xlane.xlu1 %611 }
 0x2bb   : > { %v613_v34 = vsub.f32 %v609_v22, %v612_v33 }
 0x2bd   : > { %v614_v35 = vmul.f32 1.442695, %v613_v34 }
 0x2bf   : > { %1756 = vpow2.f32 %v614_v35 }
 0x2c2   : > { %v727_v36 = vpop.xlane.xlu0 %726 }
 0x2c3   : > { %v728_v37 = vsub.f32 %v724_v29, %v727_v36 }
 0x2c5   : > { %v729_v38 = vmul.f32 1.442695, %v728_v37 }
 0x2c7   : > { %1758 = vpow2.f32 %v729_v38 }
 0x2cc   : > { %v1757_v39 = vpop.eup %1756 }
 0x2cd   : > { %v616_v40 = vsel %vm555_vm3, %v1757_v39, 0.0 }
 0x2ce   : > { %617 = vadd.xlane.f32.xlu0 %v616_v40 }
 0x2d4   : > { %v1759_v41 = vpop.eup %1758 }
 0x2d5   : > { %v731_v42 = vsel %vm555_vm3, %v1759_v41, 0.0 }
 0x2d6   : > { %732 = vadd.xlane.f32.xlu1 %v731_v42  ;;  %v1536_v42 = vld [vmem:[%s2227_s4 + $0x8] sm:$0xf] }
 0x2e4   : > { %622 = vrot.lane.b32.xlu0 %v2009_v12, %s1845_s18 }
 0x2e7   : > { %737 = vrot.lane.b32.xlu1 %v2009_v12, %s1846_s20  ;;  %s1849_s20 = smov 72  }
 0x2e8   : > { %880 = vrot.lane.b32.xlu0 %v2009_v12, %s1847_s21  ;;  %s1850_s21 = smov 104  }
 0x2eb   : > { %882 = vrot.lane.b32.xlu1 %v2009_v12, %s1848_s25  ;;  %s1851_s25 = smov 48  }
 0x357   : > { %v618_v43 = vpop.xlane.xlu0 %617 }
 0x358   : > { %1760 = vrcp.f32 %v618_v43  ;;  %v999_v43 = vsel %vm627_vm4, %v1536_v42, 0  ;;  %v1752_v42 = vld [vmem:[%s2210_s10 + $0x18] sm:$0xff]  }
 0x35b   : > { %v623_v44 = vpop.permute.xlu0 %622 }
 0x35c   : > { %v629_v45 = vsel %vm627_vm4, %v623_v44, 0 }
 0x35d   : > { %1611 = vmatpush3.bf16.msra.mxu0 %v629_v45 }
 0x35e   : > { %1622 = vmatprep.subr.bf16.mxu0 %v1840_v1 }
 0x35f   : > { %v733_v46 = vpop.xlane.xlu1 %732  ;;  %v881_v9 = vpop.permute.xlu0 %880 }
 0x360   : > { %1762 = vrcp.f32 %v733_v46 }
 0x363   : > { %v738_v49 = vpop.permute.xlu1 %737 }
 0x364   : > { %v743_v51 = vsel %vm627_vm4, %v738_v49, 0 }
 0x365   : > { %v1761_v47 = vpop.eup %1760 }
 0x366   : > { %v620_v48 = vmul.f32 %v1761_v47, %v1757_v39 }
 0x367   : > { %v883_v0 = vpop.permute.xlu1 %882 }
 0x368   : > { %v621_v50 = vpack.c.bf16 %v620_v48, %v620_v48  ;;  %v888_v6 = vsel %vm555_vm3, %v883_v0, 0 }
 0x36a   : > { %1613 = vmatmul.mubr.msk.bf16.vlgmr.msra.gmra.mxu0 %vm555_vm3, %v621_v50 }
 0x36b   : > { %1623 = vmatpush3.bf16.msra.mxu0 %v743_v51  ;;  %1624 = vmatprep.mubr.msk.bf16.mxu0 %vm1841_vm0, %v1840_v1 }
 0x36c   : > { %1634 = vmatprep.subr.bf16.mxu0 %v1840_v1 }
 0x36d   : > { %v1763_v52 = vpop.eup %1762 }
 0x36e   : > { %v735_v53 = vmul.f32 %v1763_v52, %v1759_v41 }
 0x370   : > { %v736_v54 = vpack.c.bf16 %v735_v53, %v735_v53 }
 0x372   : > { %1625 = vmatmul.mubr.msk.bf16.vlgmr.msra.gmra.mxu0 %vm555_vm3, %v736_v54 }
 0x373   : > { %1636 = vmatprep.mubr.msk.bf16.mxu0 %vm1841_vm0, %v1840_v1  ;;  %1635 = vmatpush3.bf16.msra.mxu0 %v838_v56 }
 0x374   : > { %1646 = vmatprep.subr.bf16.mxu0 %v1840_v1 }
 0x42a   : > { %v665_v59 = vpop.f32.mrf.mxu0 }
 0x42b   : > { %v671_v60 = vpack.c.bf16 %v665_v59, %v665_v59 }
 0x42c   : > { %v1614_v61 = vpop.f32.mrf.mxu0 }
 0x42d   : > { %1637 = vmatmul.mubr.msk.bf16.vlgmr.msra.gmra.mxu0 %vm555_vm3, %v671_v60 }
 0x42e   : > { %v668_v62 = vpop.f32.mrf.mxu0  ;;  %1648 = vmatprep.mubr.msk.bf16.mxu0 %vm1841_vm0, %v1840_v1 }
 0x430   : > { %v1615_v63 = vpop.f32.mrf.mxu0 }
 0x432   : > { %v779_v2 = vpop.f32.mrf.mxu0 }
 0x433   : > { %v785_v4 = vpack.c.bf16 %v779_v2, %v779_v2 }
 0x434   : > { %v1626_v5 = vpop.f32.mrf.mxu0 }
 0x435   : > { %1631 = vmatmul.mubr.msk.bf16.vlgmr.msra.gmra.mxu1 %vm555_vm3, %v785_v4 }
 0x436   : > { %1641 = vmatpush3.bf16.xpose.msra.mxu1 %v888_v6  ;;  %v782_v7 = vpop.f32.mrf.mxu0  ;;  %1642 = vmatprep.mubr.msk.bf16.mxu1 %vm1841_vm0, %v1840_v1 }
 0x437   : > { %1652 = vmatprep.subr.bf16.mxu1 %v1840_v1 }
 0x438   : > { %v1627_v8 = vpop.f32.mrf.mxu0 }
 0x43d   : > { %1643 = vmatmul.mubr.msk.bf16.vlgmr.msra.gmra.mxu1 %vm555_vm3, %v881_v9 }
 0x43e   : > { %1654 = vmatprep.mubr.msk.bf16.mxu1 %vm1841_vm0, %v1840_v1  ;;  %1653 = vmatpush3.bf16.msra.mxu1 %v999_v43  ;;  %v1753_v43 = vld [vmem:[%s2210_s10 + $0x10] sm:$0xff]  }
 0x43f   : > { %1664 = vmatprep.subr.bf16.mxu1 %v1840_v1 }
 0x4ed   : > { %v874_v10 = vpop.f32.mrf.mxu0 }
 0x4ef   : > { %v1638_v11 = vpop.f32.mrf.mxu0 }
 0x4f1   : > { %v877_v13 = vpop.f32.mrf.mxu0 }
 0x4f3   : > { %v1639_v14 = vpop.f32.mrf.mxu0 }
 0x4f5   : > { %v828_v15 = vpop.f32.mrf.mxu1 }
 0x4f6   : > { %v2072_v16 = vadd.f32 %v874_v10, %v828_v15 }
 0x4f7   : > { %v1632_v17 = vpop.f32.mrf.mxu1 }
 0x4f8   : > { %v1542_v17 = vld [vmem:[%s2228_s5] ss:$0 sm:$0xff] }
 0x4f9   : > { %v831_v18 = vpop.f32.mrf.mxu1 }
 0x4fb   : > { %v1633_v20 = vpop.f32.mrf.mxu1 }
 0x4fd   : > { %v924_v21 = vpop.f32.mrf.mxu1 }
 0x4fe   : > { %v930_v22 = vmul.f32 0.35355338, %v924_v21 }
 0x4ff   : > { %v1644_v23 = vpop.f32.mrf.mxu1 }
 0x500   : > { %v931_v24 = vadd.f32 %v2029_v19, %v930_v22 }
 0x501   : > { %v927_v25 = vpop.f32.mrf.mxu1 }
 0x502   : > { %v932_v26 = vsel %vm555_vm3, %v931_v24, -inf }
 0x503   : > { %933 = vmax.xlane.f32.xlu1 %v932_v26  ;;  %v1645_v27 = vpop.f32.mrf.mxu1 }
 0x514   : > { %1044 = vrot.lane.b32.xlu1 %v2009_v12, %s1849_s20  ;;  %s467_s20 = sand.u32 1, %s1830_s30  }
 0x515   : > { %s1435_s5 = scalar_lea.sflag [#allocation4], %s467_s20 }
 0x518   : > { %1042 = vrot.lane.b32.xlu1 %v2009_v12, %s1850_s21  ;;  %s1520_s21 = sshll.u32 %s467_s20, 3 }
 0x519   : > { %s469_s18 = scalar_lea.vmem [#allocation3], %s1520_s21 }
 0x51a   : > { %s1448_s1 = sshll.u32 %s469_s18, 4  ;;  %s1449_s1 = int_to_ptr.vmem [resolvable:$true] %s1448_s1 }
 0x51b   : > { %p1785_p0 = scmp.lt.s32.totalorder %s1449_s1, %s1783_s27 }
 0x58c   : > { %v934_v28 = vpop.xlane.xlu1 %933 }
 0x58d   : > { %v935_v29 = vsub.f32 %v931_v24, %v934_v28 }
 0x58f   : > { %v936_v30 = vmul.f32 1.442695, %v935_v29 }
 0x590   : > { %v1045_v38 = vpop.permute.xlu1 %1044 }
 0x591   : > { %1764 = vpow2.f32 %v936_v30  ;;  %v1050_v40 = vsel %vm555_vm3, %v1045_v38, 0  ;;  %v1544_v38 = vld [vmem:[%s2207_s7] ss:$0 sm:$0xff] }
 0x594   : > { %v1043_v41 = vpop.permute.xlu1 %1042 }
 0x59e   : > { %v1765_v31 = vpop.eup %1764 }
 0x59f   : > { %v938_v32 = vsel %vm555_vm3, %v1765_v31, 0.0 }
 0x5a0   : > { %939 = vadd.xlane.f32.xlu0 %v938_v32 }
 0x5b6   : > { %944 = vrot.lane.b32.xlu0 %v2009_v12, %s1851_s25  ;;  %s1778_s25 = scalar_lea.vmem %s1449_s1, 128 }
 0x5b7   : > { %p1779_p11 = scmp.ne.s32.totalorder %s1449_s1, %s1778_s25 }
 0x5b9   : > { %p1780_p12 = pnand %p1779_p11, %p1967_p5 }
 0x5bb   : > { %p1781_p13 = pneg %p1780_p12 }
 0x629   : > { %v940_v33 = vpop.xlane.xlu0 %939 }
 0x62a   : > { %1766 = vrcp.f32 %v940_v33 }
 0x62d   : > { %v945_v34 = vpop.permute.xlu0 %944 }
 0x62e   : > { %v950_v35 = vsel %vm627_vm4, %v945_v34, 0 }
 0x62f   : > { %1647 = vmatpush3.bf16.msra.mxu0 %v950_v35 }
 0x630   : > { %1658 = vmatprep.subr.bf16.mxu0 %v1840_v1 }
 0x637   : > { %v1767_v36 = vpop.eup %1766 }
 0x638   : > { %v942_v37 = vmul.f32 %v1767_v36, %v1765_v31  ;;  %v1750_v31 = vld [vmem:[%s2208_s8 + $0x8] sm:$0xff]   ;;  %v1543_v36 = vld [vmem:[%s2206_s6] ss:$0 sm:$0xff] }
 0x63a   : > { %v943_v39 = vpack.c.bf16 %v942_v37, %v942_v37 }
 0x63c   : > { %1649 = vmatmul.mubr.msk.bf16.vlgmr.msra.gmra.mxu0 %vm555_vm3, %v943_v39 }
 0x63d   : > { %1659 = vmatpush3.bf16.xpose.msra.mxu0 %v1050_v40  ;;  %1660 = vmatprep.mubr.msk.bf16.mxu0 %vm1841_vm0, %v1840_v1 }
 0x63e   : > { %1670 = vmatprep.subr.bf16.mxu0 %v1840_v1 }
 0x644   : > { %1661 = vmatmul.mubr.msk.bf16.vlgmr.msra.gmra.mxu0 %vm555_vm3, %v1043_v41 }
 0x645   : > { %1672 = vmatprep.mubr.msk.bf16.mxu0 %vm1841_vm0, %v1840_v1 }
 0x6fc   : > { %v986_v44 = vpop.f32.mrf.mxu0 }
 0x6fd   : > { %v992_v45 = vpack.c.bf16 %v986_v44, %v986_v44  ;;  %v1754_v44 = vld [vmem:[%s2210_s10 + $0x8] sm:$0xff]  }
 0x6fe   : > { %v1650_v46 = vpop.f32.mrf.mxu0 }
 0x6ff   : > { %1655 = vmatmul.mubr.msk.bf16.vlgmr.msra.gmra.mxu1 %vm555_vm3, %v992_v45  ;;  %v1755_v45 = vld [vmem:[%s2210_s10] sm:$0xff]  }
 0x700   : > { %v989_v47 = vpop.f32.mrf.mxu0  ;;  %1666 = vmatprep.mubr.msk.bf16.mxu1 %vm1841_vm0, %v1840_v1  ;;  %v1545_v46 = vld [vmem:[%s2209_s9] ss:$0 sm:$0xff] }
 0x702   : > { %v1651_v48 = vpop.f32.mrf.mxu0 }
 0x704   : > { %v1086_v49 = vpop.f32.mrf.mxu0 }
 0x705   : > { %v1092_v50 = vmul.f32 0.35355338, %v1086_v49 }
 0x706   : > { %v1662_v51 = vpop.f32.mrf.mxu0 }
 0x707   : > { %v1093_v52 = vadd.f32 %v2029_v19, %v1092_v50 }
 0x708   : > { %v1089_v53 = vpop.f32.mrf.mxu0 }
 0x709   : > { %v1094_v54 = vsel %vm555_vm3, %v1093_v52, -inf }
 0x70a   : > { %1095 = vmax.xlane.f32.xlu0 %v1094_v54  ;;  %v1663_v55 = vpop.f32.mrf.mxu0 }
 0x720   : > { %1106 = vrot.lane.b32.xlu0 %v2009_v12, %s1852_s28  ;;  %v1540_v12 = vld [vmem:[%s2227_s4 + $0xc] sm:$0xf]  ;;  %s1558_s28 = sshll.u32 %s1950_s17, 7  ;;  %s1784_s17 = scalar_lea.vmem %s1783_s27, 256 }
 0x721   : > { %v1161_v4 = vsel %vm627_vm4, %v1540_v12, 0  ;;  %s1446_s4 = scalar_lea.hbm %s2214_s14, %s1558_s28  ;;  %p1786_p1 = scmp.lt.s32.totalorder %s1784_s17, %s1778_s25 }
 0x722   : > { %1671 = vmatpush3.bf16.msra.mxu0 %v1161_v4 }
 0x723   : > { %1684 = vmatprep.subr.bf16.mxu0 %v1840_v1  ;;  %p1787_p2 = por %p1786_p1, %p1785_p0 }
 0x725   : > { %p1788_p3 = pnand %p1787_p2, %p1781_p13 }
 0x793   : > { %v1096_v56 = vpop.xlane.xlu0 %1095 }
 0x794   : > { %v1097_v57 = vsub.f32 %v1093_v52, %v1096_v56 }
 0x796   : > { %v1098_v58 = vmul.f32 1.442695, %v1097_v57 }
 0x797   : > { %v1107_v59 = vpop.permute.xlu0 %1106 }
 0x798   : > { %1768 = vpow2.f32 %v1098_v58  ;;  %v1112_v60 = vsel %vm627_vm4, %v1107_v59, 0 }
 0x799   : > { %1665 = vmatpush3.bf16.msra.mxu1 %v1112_v60 }
 0x79a   : > { %1676 = vmatprep.subr.bf16.mxu1 %v1840_v1 }
 0x7a5   : > { %v1769_v61 = vpop.eup %1768 }
 0x7a6   : > { %v1100_v19 = vsel %vm555_vm3, %v1769_v61, 0.0 }
 0x7a7   : > { %1101 = vadd.xlane.f32.xlu1 %v1100_v19 }
 0x7bf   : > { %v1035_v62 = vpop.f32.mrf.mxu1 }
 0x7c0   : > { %v1041_v63 = vadd.f32 %v1035_v62, %v2072_v16 }
 0x7c1   : > { %v1656_v0 = vpop.f32.mrf.mxu1 }
 0x7c3   : > { %v1038_v2 = vpop.f32.mrf.mxu1 }
 0x7c5   : > { %v1657_v5 = vpop.f32.mrf.mxu1 }
 0x830   : > { %v1102_v6 = vpop.xlane.xlu1 %1101 }
 0x831   : > { %1770 = vrcp.f32 %v1102_v6 }
 0x83e   : > { %v1771_v7 = vpop.eup %1770 }
 0x83f   : > { %v1104_v8 = vmul.f32 %v1771_v7, %v1769_v61  ;;  %v1549_v61 = vld [vmem:[%s2211_s11] ss:$0 sm:$0xff] }
 0x841   : > { %v1105_v9 = vpack.c.bf16 %v1104_v8, %v1104_v8 }
 0x843   : > { %1667 = vmatmul.mubr.msk.bf16.vlgmr.msra.gmra.mxu1 %vm555_vm3, %v1105_v9 }
 0x844   : > { %1680 = vmatprep.mubr.msk.bf16.mxu1 %vm1841_vm0, %v1840_v1  ;;  %1677 = vmatpush3.bf16.msra.mxu1 %v1750_v31 }
 0x845   : > { %1678 = vmatprep.subr.bf16.mxu1 %v1840_v1 }
 0x903   : > { %v1148_v10 = vpop.f32.mrf.mxu1 }
 0x904   : > { %v1154_v11 = vpack.c.bf16 %v1148_v10, %v1148_v10 }
 0x905   : > { %v1668_v13 = vpop.f32.mrf.mxu1 }
 0x906   : > { %1673 = vmatmul.mubr.msk.bf16.vlgmr.msra.gmra.mxu0 %vm555_vm3, %v1154_v11 }
 0x907   : > { %v1151_v14 = vpop.f32.mrf.mxu1  ;;  %1692 = vmatprep.mubr.msk.bf16.mxu0 %vm1841_vm0, %v1840_v1  ;;  %1685 = vmatpush3.bf16.msra.mxu0 %v1752_v42 }
 0x908   : > { %1686 = vmatprep.subr.bf16.mxu0 %v1840_v1 }
 0x909   : > { %v1669_v15 = vpop.f32.mrf.mxu1 }
 0x90a   : > { %v1555_v15 = vld [vmem:[%s2212_s12] ss:$0 sm:$0xff] }
 0x90b   : > { %1687 = vmatpush3.bf16.msra.mxu0 %v1753_v43 }
 0x90c   : > { %1688 = vmatprep.subr.bf16.mxu0 %v1840_v1 }
 0x90f   : > { %1689 = vmatpush3.bf16.msra.mxu0 %v1754_v44 }
 0x910   : > { %1690 = vmatprep.subr.bf16.mxu0 %v1840_v1 }
 0x913   : > { %1691 = vmatpush3.bf16.msra.mxu0 %v1755_v45 }
 0x9c6   : > { %v1197_v16 = vpop.f32.mrf.mxu0 }
 0x9c7   : > { %v1203_v18 = vadd.f32 %v1197_v16, %v1041_v63 }
 0x9c8   : > { %v1674_v20 = vpop.f32.mrf.mxu0 }
 0x9c9   : > { %v1211_v21 = vadd.f32 %v1542_v17, %v1203_v18  ;;  %v1556_v17 = vld [vmem:[%s2213_s13] ss:$0 sm:$0xff] }
 0x9ca   : > { %v1200_v22 = vpop.f32.mrf.mxu0 }
 0x9cb   : > { %v1212_v23 = vadd.f32 %v1211_v21, %v1999_v3  ;;  %v1751_v3 = vld [vmem:[%s2208_s8] sm:$0xff]  }
 0x9cc   : > { %v1675_v24 = vpop.f32.mrf.mxu0  ;;  %1679 = vmatpush3.bf16.msra.mxu1 %v1751_v3 }
 0x9cd   : > { %v1215_v25 = vsel %vm504_vm1, %v1212_v23, 0.0 }
 0x9ce   : > { %1216 = vadd.xlane.f32.xlu1 %v1215_v25 }
 0xa57   : > { %v1217_v26 = vpop.xlane.xlu1 %1216 }
 0xa58   : > { %v1219_v27 = vmul.f32 0.03125, %v1217_v26 }
 0xa5a   : > { %v1220_v28 = vsub.f32 %v1212_v23, %v1219_v27 }
 0xa5c   : > { %v1221_v29 = vmul.f32 %v1220_v28, %v1220_v28 }
 0xa5e   : > { %v1222_v30 = vsel %vm504_vm1, %v1221_v29, 0.0 }
 0xa5f   : > { %1223 = vadd.xlane.f32.xlu1 %v1222_v30 }
 0xae8   : > { %v1224_v32 = vpop.xlane.xlu1 %1223 }
 0xae9   : > { %v1225_v33 = vmul.f32 0.03125, %v1224_v32 }
 0xaeb   : > { %v1226_v34 = vadd.f32 1e-12, %v1225_v33 }
 0xaed   : > { %1772 = vrsqrt.f32 %v1226_v34 }
 0xafa   : > { %v1773_v35 = vpop.eup %1772 }
 0xafb   : > { %v1228_v37 = vmul.f32 %v1773_v35, %v1220_v28 }
 0xafd   : > { %v1235_v39 = vmul.f32 %v1543_v36, %v1228_v37 }
 0xaff   : > { %v1242_v40 = vadd.f32 %v1544_v38, %v1235_v39 }
 0xb01   : > { %v1243_v41 = vpack.c.bf16 %v1242_v40, %v1242_v40 }
 0xb03   : > { %1681 = vmatmul.mubr.msk.bf16.vlgmr.msra.gmra.mxu1 %vm504_vm1, %v1243_v41 }
 0xbc3   : > { %v1304_v47 = vpop.f32.mrf.mxu1 }
 0xbc4   : > { %v1305_v48 = vadd.f32 %v1545_v46, %v1304_v47 }
 0xbc5   : > { %v1682_v49 = vpop.f32.mrf.mxu1 }
 0xbc6   : > { %v1311_v50 = vmul.f32 0.044715, %v1305_v48  ;;  %v1310_v58 = vmul.f32 0.5, %v1305_v48 }
 0xbc7   : > { %v1307_v51 = vpop.f32.mrf.mxu1 }
 0xbc8   : > { %v1312_v52 = vmul.f32 %v1311_v50, %v1305_v48 }
 0xbc9   : > { %v1683_v53 = vpop.f32.mrf.mxu1 }
 0xbca   : > { %v1313_v54 = vmul.f32 %v1312_v52, %v1305_v48 }
 0xbcc   : > { %v1314_v55 = vadd.f32 %v1313_v54, %v1305_v48 }
 0xbce   : > { %v1315_v56 = vmul.f32 0.7978846, %v1314_v55 }
 0xbd0   : > { %1774 = vtanh.f32 %v1315_v56 }
 0xbdd   : > { %v1775_v57 = vpop.eup %1774 }
 0xbde   : > { %v1317_v59 = vadd.f32 1.0, %v1775_v57 }
 0xbe0   : > { %v1318_v1 = vmul.f32 %v1317_v59, %v1310_v58 }
 0xbe2   : > { %v1319_v60 = vpack.c.bf16 %v1318_v1, %v1318_v1 }
 0xbe4   : > { %1693 = vmatmul.mubr.msk.bf16.vlgmr.msra.gmra.mxu0 %vm1359_vm5, %v1319_v60 }
 0xca4   : > { %v1397_v19 = vpop.f32.mrf.mxu0 }
 0xca5   : > { %v1398_v62 = vadd.f32 %v1549_v61, %v1397_v19 }
 0xca6   : > { %v1694_v63 = vpop.f32.mrf.mxu0 }
 0xca7   : > { %v1403_v0 = vadd.f32 %v1398_v62, %v1242_v40 }
 0xca8   : > { %v1400_v2 = vpop.f32.mrf.mxu0 }
 0xca9   : > { %v1406_v12 = vsel %vm504_vm1, %v1403_v0, 0.0 }
 0xcaa   : > { %1407 = vadd.xlane.f32.xlu1 %v1406_v12  ;;  %v1695_v4 = vpop.f32.mrf.mxu0 }
 0xd33   : > { %v1408_v5 = vpop.xlane.xlu1 %1407 }
 0xd34   : > { %v1409_v6 = vmul.f32 0.03125, %v1408_v5 }
 0xd36   : > { %v1410_v7 = vsub.f32 %v1403_v0, %v1409_v6 }
 0xd38   : > { %v1411_v8 = vmul.f32 %v1410_v7, %v1410_v7 }
 0xd3a   : > { %v1412_v9 = vsel %vm504_vm1, %v1411_v8, 0.0 }
 0xd3b   : > { %1413 = vadd.xlane.f32.xlu1 %v1412_v9 }
 0xdc4   : > { %v1414_v10 = vpop.xlane.xlu1 %1413 }
 0xdc5   : > { %v1415_v11 = vmul.f32 0.03125, %v1414_v10 }
 0xdc7   : > { %v1416_v13 = vadd.f32 1e-12, %v1415_v11 }
 0xdc9   : > { %1776 = vrsqrt.f32 %v1416_v13 }
 0xdd6   : > { %v1777_v14 = vpop.eup %1776 }
 0xdd7   : > { %v1418_v16 = vmul.f32 %v1777_v14, %v1410_v7 }
 0xdd9   : > { %v1425_v18 = vmul.f32 %v1555_v15, %v1418_v16 }
 0xddb   : > { %v1432_v20 = vadd.f32 %v1556_v17, %v1425_v18 }
 0xddd   : > { %1433 = vst.msk [vmem:[%s469_s18] sm:$0xff] %vm504_vm1, %v1432_v20 }
 0xdde   : > { %1791 = shalt.err (!%p1788_p3)
}
 0xddf   : > { %s1792_s2 = scalar_lea.hbm %s1446_s4, 128  ;;  %s1796_s21 = scalar_lea.hbm %s2214_s14, 256 }
 0xde0   : > { %p1793_p4 = scmp.ne.s32.totalorder %s1446_s4, %s1792_s2  ;;  %p1797_p9 = scmp.lt.s32.totalorder %s1446_s4, %s2214_s14 }
 0xde1   : > { %p1798_p10 = scmp.lt.s32.totalorder %s1796_s21, %s1792_s2 }
 0xde2   : > { %p1794_p7 = pnand %p1793_p4, %p1967_p5 }
 0xde3   : > { %p1799_p11 = por %p1798_p10, %p1797_p9 }
 0xde4   : > { %p1795_p8 = pneg %p1794_p7 }
 0xde6   : > { %p1800_p12 = pnand %p1799_p11, %p1795_p8 }
 0xde8   : > { %1803 = shalt.err (!%p1800_p12)
}
 0xde9   : > { %1696 = dma.vmem_to_hbm [thread:$0]  (%p1967_p5), %s1449_s1, 128, %s1446_s4, %s1435_s5  }
 0xdea PF: > { %p1702_p13 = scmp.ge.s32.totalorder %s1838_s16, 2  ;;  %s1460_s18 = sand.u32 1, %s1826_s29  }
 0xdeb   : > { %s1461_s25 = scalar_lea.sflag [#allocation4], %s1460_s18 }
 0xdec   : > { %p1699_p0 = pnand %p1702_p13, %p1971_p6 }
 0xdee   : > { %p1700_p1 = pneg %p1699_p0 }
 0xdf0   : > { %1821 = dma.done.wait (%p1700_p1), %s1461_s25, 128  }
 0xdf1   : > { %1823 = vsyncadd (%p1700_p1), %s1461_s25, 4294967168  ;;  %p24_p2 = scmp.ge.s32.totalorder %s1954_s19, 4   ;;  %s2229_s29 = smov %s1830_s30 }
 0xdf2   : > { %s2230_s30 = smov %s1834_s15  ;;  %s2231_s15 = smov %s1965_s22 }
 0xdf3   : > { %s2232_s16 = smov %s1954_s19  ;;  %26 = sbr.rel (!%p24_p2) target bundleno = 10 (0xa), region = 117 }
 0xdf8   :  { %1466 = vsyncpa [#allocation4], 1 }
 0xdf9   :  { %1468 = vsyncpa [#allocation4 + $0x1], 1 }

// kernel: bert_encoder_forward.2
= control target key start
LH: loop header
LB: loop body
LE: loop exit
PB: predicated region body
PF: predicated region fallthrough
CT: control target
= control target key end

     0   :  { %19 = vsyncpa [#allocation4], 0  ;;  %s2638_s0 = inlined_call_operand.vmem [shape: f32[2,8,32], index: 0, kind: input, shape index: {}]   ;;  %s2639_s1 = inlined_call_operand.vmem [shape: f32[2,1,8], index: 1, kind: input, shape index: {}]   ;;  %s2640_s2 = inlined_call_operand.vmem [shape: bf16[32,96], index: 2, kind: input, shape index: {}]   ;;  %s2641_s3 = inlined_call_operand.vmem [shape: f32[1,96], index: 3, kind: input, shape index: {}]   ;;  %s2642_s4 = inlined_call_operand.vmem [shape: bf16[4,8,32], index: 4, kind: input, shape index: {}]   ;;  %s2643_s5 = inlined_call_operand.hbm [shape: f32[1,32], index: 5, kind: input, shape index: {}]   ;;  %s2644_s6 = inlined_call_operand.hbm [shape: f32[1,32], index: 6, kind: input, shape index: {}]   ;;  %s2645_s7 = inlined_call_operand.hbm [shape: f32[1,32], index: 7, kind: input, shape index: {}]   ;;  %s2646_s8 = inlined_call_operand.hbm [shape: bf16[32,64], index: 8, kind: input, shape index: {}]   ;;  %s2647_s9 = inlined_call_operand.hbm [shape: f32[1,64], index: 9, kind: input, shape index: {}]   ;;  %s2648_s10 = inlined_call_operand.vmem [shape: bf16[64,32], index: 10, kind: input, shape index: {}]   ;;  %s2649_s11 = inlined_call_operand.hbm [shape: f32[1,32], index: 11, kind: input, shape index: {}]   ;;  %s2650_s12 = inlined_call_operand.hbm [shape: f32[1,32], index: 12, kind: input, shape index: {}]   ;;  %s2651_s13 = inlined_call_operand.hbm [shape: f32[1,32], index: 13, kind: input, shape index: {}]   ;;  %s2652_s14 = inlined_call_operand.vmem [shape: f32[2,8,32], index: 14, kind: output, shape index: {}]  }
   0x1   :  { %20 = vsyncpa [#allocation6], 0 }
   0x2   :  { %21 = vsyncpa [#allocation9], 0 }
   0x3   :  { %22 = vsyncpa [#allocation12], 0 }
   0x4   :  { %23 = vsyncpa [#allocation15], 0  ;;  %s2341_s29 = smov 0  }
   0x5 LB: > { %s2243_s30 = smov [#allocation5]   ;;  %s2347_s16 = sadd.s32 4294967295, %s2241_s29   ;;  %s2241_s29 = sphi %s2341_s29, %s29_s29  }
   0x6   : > { %s397_s15 = sshll.u32 %s2243_s30, 4  ;;  %p1680_p0 = scmp.ge.s32.totalorder %s2241_s29, 1  ;;  %s398_s15 = int_to_ptr.vmem [resolvable:$true] %s397_s15 }
   0x7   : > { %p364_p1 = scmp.lt.s32.totalorder %s2241_s29, 3  ;;  %p2653_p2 = scmp.eq.s32.totalorder %s2347_s16, 0 }
   0x8   : > { %s2244_s18 = smov [#allocation8]   ;;  %s2245_s21 = smov [#allocation11]  }
   0x9   : > { %p2352_p3 = pnand %p1680_p0, %p364_p1  ;;  %s418_s19 = sshll.u32 %s2244_s18, 4  ;;  %s2358_s19 = int_to_ptr.vmem [resolvable:$true] %s418_s19 }
   0xa   : > { %s446_s22 = sshll.u32 %s2245_s21, 4  ;;  %s2246_s23 = smov [#allocation3]   ;;  %s2366_s22 = int_to_ptr.vmem [resolvable:$true] %s446_s22 }
   0xb   : > { %p1905_p4 = pneg %p2352_p3  ;;  %s2368_s24 = sshll.u32 %s2246_s23, 4  ;;  %s387_s24 = int_to_ptr.vmem [resolvable:$true] %s2368_s24 }
   0xc   : > { %s2018_s26 = scalar_lea.vmem %s398_s15, 16  ;;  %s2025_s27 = scalar_lea.vmem %s398_s15, 32 }
   0xd   : > { %p2362_p5 = pnand %p2653_p2, %p1905_p4  ;;  %p2019_p7 = scmp.ne.s32.totalorder %s398_s15, %s2018_s26 }
   0xe   : > { %p2026_p10 = scmp.lt.s32.totalorder %s398_s15, %s398_s15  ;;  %p2027_p11 = scmp.lt.s32.totalorder %s2025_s27, %s2018_s26 }
   0xf   : > { %p2372_p6 = pneg %p2362_p5 }
  0x10   : > { %p2028_p12 = por %p2027_p11, %p2026_p10 }
  0x11   : > { %p2021_p8 = pnand %p2019_p7, %p2372_p6 }
  0x13   : > { %p2022_p9 = pneg %p2021_p8 }
  0x15   : > { %p2029_p13 = pnand %p2028_p12, %p2022_p9 }
  0x17   : > { %2032 = shalt.err (!%p2029_p13)
}
  0x18   : > { %1911 = dma.hbm_to_vmem [thread:$0]  (!%p2362_p5), %s2644_s6, 16, %s398_s15, [#allocation6]  }
  0x19   : > { %s2044_s18 = scalar_lea.vmem %s2358_s19, 256  ;;  %p2052_p7 = scmp.lt.s32.totalorder %s2358_s19, %s2358_s19 }
  0x1a   : > { %p2045_p0 = scmp.ne.s32.totalorder %s2358_s19, %s2044_s18  ;;  %p2053_p8 = scmp.lt.s32.totalorder %s2044_s18, %s2044_s18 }
  0x1c   : > { %p2047_p1 = pnand %p2045_p0, %p2372_p6  ;;  %p2054_p9 = por %p2053_p8, %p2052_p7 }
  0x1e   : > { %p2048_p4 = pneg %p2047_p1 }
  0x20   : > { %p2055_p10 = pnand %p2054_p9, %p2048_p4 }
  0x22   : > { %2058 = shalt.err (!%p2055_p10)
}
  0x23   : > { %s2247_s21 = smov 64   ;;  %s2248_s15 = smov 4  }
  0x24   : > { %1917 = dma.hbm_to_vmem [thread:$0]  (!%p2362_p5), %s2646_s8, 256, %s2358_s19, [#allocation9], %s2247_s21, %s2247_s21, %s2248_s15  }
  0x25   : > { %s2070_s27 = scalar_lea.vmem %s2366_s22, 16  ;;  %s2077_s28 = scalar_lea.vmem %s2366_s22, 32 }
  0x26   : > { %p2071_p11 = scmp.ne.s32.totalorder %s2366_s22, %s2070_s27  ;;  %p2078_p0 = scmp.lt.s32.totalorder %s2366_s22, %s2366_s22 }
  0x27   : > { %p2079_p1 = scmp.lt.s32.totalorder %s2077_s28, %s2070_s27 }
  0x28   : > { %p2073_p12 = pnand %p2071_p11, %p2372_p6 }
  0x29   : > { %p2080_p4 = por %p2079_p1, %p2078_p0 }
  0x2a   : > { %p2074_p13 = pneg %p2073_p12 }
  0x2c   : > { %p2081_p7 = pnand %p2080_p4, %p2074_p13 }
  0x2e   : > { %2084 = shalt.err (!%p2081_p7)
}
  0x2f   : > { %1923 = dma.hbm_to_vmem [thread:$0]  (!%p2362_p5), %s2649_s11, 16, %s2366_s22, [#allocation12]  }
  0x30   : > { %s2096_s19 = scalar_lea.vmem %s387_s24, 16  ;;  %s2103_s21 = scalar_lea.vmem %s387_s24, 32 }
  0x31   : > { %p2097_p8 = scmp.ne.s32.totalorder %s387_s24, %s2096_s19  ;;  %p2104_p11 = scmp.lt.s32.totalorder %s387_s24, %s387_s24 }
  0x32   : > { %p2105_p12 = scmp.lt.s32.totalorder %s2103_s21, %s2096_s19 }
  0x33   : > { %p2099_p9 = pnand %p2097_p8, %p2372_p6 }
  0x34   : > { %p2106_p13 = por %p2105_p12, %p2104_p11 }
  0x35   : > { %p2100_p10 = pneg %p2099_p9 }
  0x37   : > { %p2107_p0 = pnand %p2106_p13, %p2100_p10 }
  0x39   : > { %2110 = shalt.err (!%p2107_p0)
}
  0x3a   : > { %1908 = dma.hbm_to_vmem [thread:$0]  (!%p2362_p5), %s2643_s5, 16, %s387_s24, [#allocation4]  }
  0x3b   : > { %s2249_s22 = smov [#allocation7]   ;;  %s2250_s27 = smov [#allocation10]  }
  0x3c   : > { %s408_s26 = sshll.u32 %s2249_s22, 4  ;;  %s432_s28 = sshll.u32 %s2250_s27, 4  ;;  %s409_s26 = int_to_ptr.vmem [resolvable:$true] %s408_s26  ;;  %s433_s28 = int_to_ptr.vmem [resolvable:$true] %s432_s28 }
  0x3d   : > { %s2122_s30 = scalar_lea.vmem %s409_s26, 16  ;;  %s2129_s18 = scalar_lea.vmem %s409_s26, 32 }
  0x3e   : > { %p2123_p1 = scmp.ne.s32.totalorder %s409_s26, %s2122_s30  ;;  %p2130_p8 = scmp.lt.s32.totalorder %s409_s26, %s409_s26 }
  0x3f   : > { %p2131_p9 = scmp.lt.s32.totalorder %s2129_s18, %s2122_s30 }
  0x40   : > { %p2125_p4 = pnand %p2123_p1, %p2372_p6 }
  0x41   : > { %p2132_p10 = por %p2131_p9, %p2130_p8 }
  0x42   : > { %p2126_p7 = pneg %p2125_p4 }
  0x44   : > { %p2133_p11 = pnand %p2132_p10, %p2126_p7 }
  0x46   : > { %2136 = shalt.err (!%p2133_p11)
}
  0x47   : > { %1914 = dma.hbm_to_vmem [thread:$0]  (!%p2362_p5), %s2645_s7, 16, %s409_s26, [#allocation6]  }
  0x48   : > { %s2148_s21 = scalar_lea.vmem %s433_s28, 16  ;;  %s2155_s15 = scalar_lea.vmem %s433_s28, 32 }
  0x49   : > { %p2149_p12 = scmp.ne.s32.totalorder %s433_s28, %s2148_s21  ;;  %p2156_p1 = scmp.lt.s32.totalorder %s433_s28, %s433_s28 }
  0x4a   : > { %p2157_p4 = scmp.lt.s32.totalorder %s2155_s15, %s2148_s21 }
  0x4b   : > { %p2151_p13 = pnand %p2149_p12, %p2372_p6 }
  0x4c   : > { %p2158_p2 = por %p2157_p4, %p2156_p1 }
  0x4d   : > { %p2152_p0 = pneg %p2151_p13 }
  0x4f   : > { %p2159_p8 = pnand %p2158_p2, %p2152_p0 }
  0x51   : > { %2162 = shalt.err (!%p2159_p8)
}
  0x52   : > { %1920 = dma.hbm_to_vmem [thread:$0]  (!%p2362_p5), %s2647_s9, 16, %s433_s28, [#allocation9]  }
  0x53   : > { %s2251_s26 = smov [#allocation13]   ;;  %s2252_s30 = smov [#allocation14]  }
  0x54   : > { %s457_s27 = sshll.u32 %s2251_s26, 4  ;;  %s468_s18 = sshll.u32 %s2252_s30, 4  ;;  %s458_s27 = int_to_ptr.vmem [resolvable:$true] %s457_s27  ;;  %s469_s18 = int_to_ptr.vmem [resolvable:$true] %s468_s18 }
  0x55   : > { %s2174_s19 = scalar_lea.vmem %s458_s27, 16  ;;  %s2181_s24 = scalar_lea.vmem %s458_s27, 32 }
  0x56   : > { %p2175_p7 = scmp.ne.s32.totalorder %s458_s27, %s2174_s19  ;;  %p2182_p2 = scmp.lt.s32.totalorder %s458_s27, %s458_s27 }
  0x57   : > { %p2183_p11 = scmp.lt.s32.totalorder %s2181_s24, %s2174_s19 }
  0x58   : > { %p2177_p9 = pnand %p2175_p7, %p2372_p6 }
  0x59   : > { %p2184_p12 = por %p2183_p11, %p2182_p2 }
  0x5a   : > { %p2178_p10 = pneg %p2177_p9 }
  0x5c   : > { %p2185_p13 = pnand %p2184_p12, %p2178_p10 }
  0x5e   : > { %2188 = shalt.err (!%p2185_p13)
}
  0x5f   : > { %1926 = dma.hbm_to_vmem [thread:$0]  (!%p2362_p5), %s2650_s12, 16, %s458_s27, [#allocation12]  }
  0x60   : > { %s2200_s15 = scalar_lea.vmem %s469_s18, 16  ;;  %s2207_s23 = scalar_lea.vmem %s469_s18, 32 }
  0x61   : > { %p2201_p0 = scmp.ne.s32.totalorder %s469_s18, %s2200_s15  ;;  %p2208_p8 = scmp.lt.s32.totalorder %s469_s18, %s469_s18 }
  0x62   : > { %p2209_p7 = scmp.lt.s32.totalorder %s2207_s23, %s2200_s15 }
  0x63   : > { %p2203_p1 = pnand %p2201_p0, %p2372_p6 }
  0x64   : > { %p2210_p9 = por %p2209_p7, %p2208_p8 }
  0x65   : > { %p2204_p4 = pneg %p2203_p1 }
  0x67   : > { %p2211_p2 = pnand %p2210_p9, %p2204_p4 }
  0x69   : > { %2214 = shalt.err (!%p2211_p2)
}
  0x6a   : > { %1929 = dma.hbm_to_vmem [thread:$0]  (!%p2362_p5), %s2651_s13, 16, %s469_s18, [#allocation15]  }
  0x6b   : > { %494 = sbr.rel (%p2352_p3) target bundleno = 3652 (0xe44), region = 76  ;;  %p2657_p10 = scmp.eq.s32.totalorder (!%p2352_p3), %s2347_s16, 0 }
  0x70   : > { %2220 = dma.done.wait (%p2657_p10), [#allocation4], 16   ;;  %p2658_p6 = pmov %p2657_p10 }
  0x72   : > { %2222 = vsyncadd (%p2658_p6), [#allocation4], 4294967280  ;;  %p2659_p11 = pmov %p2658_p6 }
  0x73   : > { %p2660_p12 = pmov %p2658_p6 }
  0x74   : > { %2224 = dma.done.wait (%p2659_p11), [#allocation6], 32  }
  0x75   : > { %2226 = vsyncadd (%p2660_p12), [#allocation6], 4294967264  ;;  %p2661_p13 = pmov %p2658_p6 }
  0x76   : > { %p2662_p5 = pmov %p2658_p6 }
  0x77   : > { %2228 = dma.done.wait (%p2661_p13), [#allocation9], 272  }
  0x78   : > { %2230 = vsyncadd (%p2662_p5), [#allocation9], 4294967024  ;;  %p2663_p3 = pmov %p2662_p5 }
  0x7a   : > { %2232 = dma.done.wait (%p2663_p3), [#allocation12], 32   ;;  %p2664_p0 = pmov %p2663_p3 }
  0x7c   : > { %2234 = vsyncadd (%p2664_p0), [#allocation12], 4294967264  ;;  %p2665_p1 = pmov %p2664_p0 }
  0x7d   : > { %p2666_p4 = pmov %p2664_p0 }
  0x7e   : > { %2236 = dma.done.wait (%p2665_p1), [#allocation15], 16  }
  0x7f   : > { %2238 = vsyncadd (%p2666_p4), [#allocation15], 4294967280  ;;  %p569_p8 = scmp.lt.s32.totalorder %s2347_s16, 1  ;;  %v2253_v0 = vmov 0.0   ;;  %vm2254_vm0 = vmmov 0   ;;  %v1977_v1 = vld [vmem:[%s2640_s2 + $0x8] sm:$0xff]  }
  0x80   : > { %1773 = vmatprep.subr.bf16.mxu1 %v2253_v0  ;;  %1777 = vmatprep.mubr.msk.bf16.mxu1 %vm2254_vm0, %v2253_v0  ;;  %v1978_v2 = vld [vmem:[%s2640_s2] sm:$0xff]   ;;  %vm607_vm1 = vcmask 261120   ;;  %vm651_vm2 = vcmask 785408   ;;  %s2255_s15 = smov 120   ;;  %s2256_s23 = smov 96   ;;  %vm658_vm3 = vcmask 64512  }
  0x81   : > { %s2668_s16 = smov (!%p569_p8, %s2347_s16), 1  ;;  %1787 = vmatprep.subr.bf16.mxu0 %v2253_v0  ;;  %1789 = vmatprep.mubr.msk.bf16.mxu0 %vm2254_vm0, %v2253_v0  ;;  %v1701_v5 = vld [vmem:[%s2641_s3] ss:$0 sm:$0xff]  ;;  %s2257_s22 = smov 88   ;;  %vm730_vm4 = vcmask 1043456   ;;  %vm1462_vm5 = vcmask 523264  }
  0x82   : > { %s1699_s17 = sshll.u32 %s2668_s16, 3  ;;  %1774 = vmatpush3.bf16.msra.mxu1 %v1977_v1  ;;  %s575_s25 = scalar_lea.vmem %s2639_s1, %s2668_s16  ;;  %v775_v55 = vld [vmem:[%s2642_s4] sm:$0xf]  ;;  %v1710_v57 = vld [vmem:[%s2642_s4 + $0x4] sm:$0xf] }
  0x83   : > { %s572_s27 = scalar_lea.vmem %s2638_s0, %s1699_s17  ;;  %1775 = vmatprep.subr.bf16.mxu1 %v2253_v0  ;;  %v2520_v19 = vld [vmem:[%s575_s25] ss:$0 sm:$0xff]  ;;  %s2259_s30 = smov 56   ;;  %v941_v56 = vsel %vm730_vm4, %v775_v55, 0  ;;  %v895_v58 = vsel %vm730_vm4, %v1710_v57, 0 }
  0x84   : > { %v2488_v3 = vld [vmem:[%s572_s27] sm:$0xff]  ;;  %s2258_s27 = smov 64   ;;  %s2260_s18 = smov 112  }
  0x85   : > { %v583_v4 = vpack.c.bf16 %v2488_v3, %v2488_v3  ;;  %s2261_s19 = smov 80   ;;  %s2264_s26 = smov 48  }
  0x86   : > { %1776 = vmatpush3.bf16.msra.mxu1 %v1978_v2 }
  0x87   : > { %1781 = vmatprep.subr.bf16.mxu1 %v2253_v0 }
  0x89   : > { %1778 = vmatmul.mubr.msk.bf16.vlgmr.msra.gmra.mxu1 %vm607_vm1, %v583_v4 }
  0x8a   : > { %1783 = vmatprep.mubr.msk.bf16.mxu1 %vm2254_vm0, %v2253_v0 }
 0x149   : > { %v645_v6 = vpop.f32.mrf.mxu1 }
 0x14a   : > { %v646_v7 = vadd.f32 %v1701_v5, %v645_v6 }
 0x14b   : > { %v1779_v8 = vpop.f32.mrf.mxu1 }
 0x14c   : > { %652 = vst.msk [vmem:[#allocation2] sm:$0xff] %vm651_vm2, %v646_v7 }
 0x14d   : > { %v648_v9 = vpop.f32.mrf.mxu1 }
 0x14f   : > { %v1780_v10 = vpop.f32.mrf.mxu1 }
 0x153   : > { %v653_v11 = vld [vmem:[#allocation2] sm:$0xff] }
 0x154   : > { %v2500_v12 = vpack.c.bf16 %v653_v11, %v653_v11 }
 0x156   : > { %776 = vrot.lane.b32.xlu1 %v2500_v12, %s2255_s15  ;;  %656 = vrot.lane.b32.xlu0 %v2500_v12, %s2256_s23  ;;  %s2262_s23 = smov 72  }
 0x15a   : > { %778 = vrot.lane.b32.xlu0 %v2500_v12, %s2257_s22  ;;  %s2263_s22 = smov 104  }
 0x1c8   : > { %v657_v13 = vpop.permute.xlu0 %656  ;;  %v777_v17 = vpop.permute.xlu1 %776 }
 0x1c9   : > { %v663_v14 = vsel %vm658_vm3, %v657_v13, 0 }
 0x1ca   : > { %1782 = vmatpush3.bf16.xpose.msra.mxu1 %v663_v14 }
 0x1cb   : > { %1793 = vmatprep.subr.bf16.mxu1 %v2253_v0 }
 0x1cc   : > { %v779_v15 = vpop.permute.xlu0 %778 }
 0x1cd   : > { %v784_v16 = vsel %vm658_vm3, %v779_v15, 0 }
 0x1d1   : > { %1784 = vmatmul.mubr.msk.bf16.vlgmr.msra.gmra.mxu1 %vm658_vm3, %v2500_v12 }
 0x1d2   : > { %1794 = vmatpush3.bf16.xpose.msra.mxu1 %v784_v16  ;;  %1795 = vmatprep.mubr.msk.bf16.mxu1 %vm2254_vm0, %v2253_v0 }
 0x1d3   : > { %1805 = vmatprep.subr.bf16.mxu1 %v2253_v0 }
 0x1d9   : > { %1796 = vmatmul.mubr.msk.bf16.vlgmr.msra.gmra.mxu1 %vm658_vm3, %v777_v17 }
 0x1da   : > { %1807 = vmatprep.mubr.msk.bf16.mxu1 %vm2254_vm0, %v2253_v0  ;;  %1806 = vmatpush3.bf16.msra.mxu1 %v895_v58 }
 0x1db   : > { %1817 = vmatprep.subr.bf16.mxu1 %v2253_v0 }
 0x291   : > { %v699_v18 = vpop.f32.mrf.mxu1 }
 0x292   : > { %v705_v20 = vmul.f32 0.35355338, %v699_v18 }
 0x293   : > { %v1785_v21 = vpop.f32.mrf.mxu1 }
 0x294   : > { %v712_v22 = vadd.f32 %v2520_v19, %v705_v20 }
 0x295   : > { %v702_v23 = vpop.f32.mrf.mxu1 }
 0x296   : > { %v713_v24 = vsel %vm658_vm3, %v712_v22, -inf }
 0x297   : > { %714 = vmax.xlane.f32.xlu1 %v713_v24  ;;  %v1786_v25 = vpop.f32.mrf.mxu1 }
 0x299   : > { %v820_v26 = vpop.f32.mrf.mxu1 }
 0x29a   : > { %v826_v27 = vmul.f32 0.35355338, %v820_v26 }
 0x29b   : > { %v1797_v28 = vpop.f32.mrf.mxu1 }
 0x29c   : > { %v827_v29 = vadd.f32 %v2520_v19, %v826_v27 }
 0x29d   : > { %v823_v30 = vpop.f32.mrf.mxu1 }
 0x29e   : > { %v828_v31 = vsel %vm658_vm3, %v827_v29, -inf }
 0x29f   : > { %829 = vmax.xlane.f32.xlu0 %v828_v31  ;;  %v1798_v32 = vpop.f32.mrf.mxu1 }
 0x320   : > { %v715_v33 = vpop.xlane.xlu1 %714 }
 0x321   : > { %v716_v34 = vsub.f32 %v712_v22, %v715_v33 }
 0x323   : > { %v717_v35 = vmul.f32 1.442695, %v716_v34 }
 0x325   : > { %1985 = vpow2.f32 %v717_v35 }
 0x328   : > { %v830_v36 = vpop.xlane.xlu0 %829 }
 0x329   : > { %v831_v37 = vsub.f32 %v827_v29, %v830_v36 }
 0x32b   : > { %v832_v38 = vmul.f32 1.442695, %v831_v37 }
 0x32d   : > { %1987 = vpow2.f32 %v832_v38 }
 0x332   : > { %v1986_v39 = vpop.eup %1985 }
 0x333   : > { %v719_v40 = vsel %vm658_vm3, %v1986_v39, 0.0 }
 0x334   : > { %720 = vadd.xlane.f32.xlu0 %v719_v40 }
 0x33a   : > { %v1988_v41 = vpop.eup %1987 }
 0x33b   : > { %v834_v42 = vsel %vm658_vm3, %v1988_v41, 0.0 }
 0x33c   : > { %835 = vadd.xlane.f32.xlu1 %v834_v42  ;;  %v1715_v42 = vld [vmem:[%s2642_s4 + $0x8] sm:$0xf] }
 0x34a   : > { %725 = vrot.lane.b32.xlu0 %v2500_v12, %s2258_s27  ;;  %s2265_s27 = smov 40  }
 0x34d   : > { %840 = vrot.lane.b32.xlu1 %v2500_v12, %s2259_s30 }
 0x34e   : > { %983 = vrot.lane.b32.xlu0 %v2500_v12, %s2260_s18 }
 0x351   : > { %985 = vrot.lane.b32.xlu1 %v2500_v12, %s2261_s19 }
 0x3bd   : > { %v721_v43 = vpop.xlane.xlu0 %720 }
 0x3be   : > { %1989 = vrcp.f32 %v721_v43  ;;  %v1102_v43 = vsel %vm730_vm4, %v1715_v42, 0  ;;  %v1981_v42 = vld [vmem:[%s2648_s10 + $0x18] sm:$0xff]  }
 0x3c1   : > { %v726_v44 = vpop.permute.xlu0 %725 }
 0x3c2   : > { %v732_v45 = vsel %vm730_vm4, %v726_v44, 0 }
 0x3c3   : > { %1788 = vmatpush3.bf16.msra.mxu0 %v732_v45 }
 0x3c4   : > { %1799 = vmatprep.subr.bf16.mxu0 %v2253_v0 }
 0x3c5   : > { %v836_v46 = vpop.xlane.xlu1 %835  ;;  %v984_v9 = vpop.permute.xlu0 %983 }
 0x3c6   : > { %1991 = vrcp.f32 %v836_v46 }
 0x3c9   : > { %v841_v49 = vpop.permute.xlu1 %840 }
 0x3ca   : > { %v846_v51 = vsel %vm730_vm4, %v841_v49, 0 }
 0x3cb   : > { %v1990_v47 = vpop.eup %1989 }
 0x3cc   : > { %v723_v48 = vmul.f32 %v1990_v47, %v1986_v39 }
 0x3cd   : > { %v986_v1 = vpop.permute.xlu1 %985 }
 0x3ce   : > { %v724_v50 = vpack.c.bf16 %v723_v48, %v723_v48  ;;  %v991_v6 = vsel %vm658_vm3, %v986_v1, 0 }
 0x3d0   : > { %1790 = vmatmul.mubr.msk.bf16.vlgmr.msra.gmra.mxu0 %vm658_vm3, %v724_v50 }
 0x3d1   : > { %1800 = vmatpush3.bf16.msra.mxu0 %v846_v51  ;;  %1801 = vmatprep.mubr.msk.bf16.mxu0 %vm2254_vm0, %v2253_v0 }
 0x3d2   : > { %1811 = vmatprep.subr.bf16.mxu0 %v2253_v0 }
 0x3d3   : > { %v1992_v52 = vpop.eup %1991 }
 0x3d4   : > { %v838_v53 = vmul.f32 %v1992_v52, %v1988_v41 }
 0x3d6   : > { %v839_v54 = vpack.c.bf16 %v838_v53, %v838_v53 }
 0x3d8   : > { %1802 = vmatmul.mubr.msk.bf16.vlgmr.msra.gmra.mxu0 %vm658_vm3, %v839_v54 }
 0x3d9   : > { %1813 = vmatprep.mubr.msk.bf16.mxu0 %vm2254_vm0, %v2253_v0  ;;  %1812 = vmatpush3.bf16.msra.mxu0 %v941_v56 }
 0x3da   : > { %1823 = vmatprep.subr.bf16.mxu0 %v2253_v0 }
 0x490   : > { %v768_v59 = vpop.f32.mrf.mxu0 }
 0x491   : > { %v774_v60 = vpack.c.bf16 %v768_v59, %v768_v59 }
 0x492   : > { %v1791_v61 = vpop.f32.mrf.mxu0 }
 0x493   : > { %1814 = vmatmul.mubr.msk.bf16.vlgmr.msra.gmra.mxu0 %vm658_vm3, %v774_v60 }
 0x494   : > { %v771_v62 = vpop.f32.mrf.mxu0  ;;  %1825 = vmatprep.mubr.msk.bf16.mxu0 %vm2254_vm0, %v2253_v0 }
 0x496   : > { %v1792_v63 = vpop.f32.mrf.mxu0 }
 0x498   : > { %v882_v2 = vpop.f32.mrf.mxu0 }
 0x499   : > { %v888_v4 = vpack.c.bf16 %v882_v2, %v882_v2 }
 0x49a   : > { %v1803_v5 = vpop.f32.mrf.mxu0 }
 0x49b   : > { %1808 = vmatmul.mubr.msk.bf16.vlgmr.msra.gmra.mxu1 %vm658_vm3, %v888_v4 }
 0x49c   : > { %1818 = vmatpush3.bf16.xpose.msra.mxu1 %v991_v6  ;;  %v885_v7 = vpop.f32.mrf.mxu0  ;;  %1819 = vmatprep.mubr.msk.bf16.mxu1 %vm2254_vm0, %v2253_v0 }
 0x49d   : > { %1829 = vmatprep.subr.bf16.mxu1 %v2253_v0 }
 0x49e   : > { %v1804_v8 = vpop.f32.mrf.mxu0 }
 0x4a3   : > { %1820 = vmatmul.mubr.msk.bf16.vlgmr.msra.gmra.mxu1 %vm658_vm3, %v984_v9 }
 0x4a4   : > { %1831 = vmatprep.mubr.msk.bf16.mxu1 %vm2254_vm0, %v2253_v0  ;;  %1830 = vmatpush3.bf16.msra.mxu1 %v1102_v43  ;;  %v1982_v43 = vld [vmem:[%s2648_s10 + $0x10] sm:$0xff]  }
 0x4a5   : > { %1841 = vmatprep.subr.bf16.mxu1 %v2253_v0 }
 0x553   : > { %v977_v10 = vpop.f32.mrf.mxu0 }
 0x555   : > { %v1815_v11 = vpop.f32.mrf.mxu0 }
 0x557   : > { %v980_v13 = vpop.f32.mrf.mxu0 }
 0x559   : > { %v1816_v14 = vpop.f32.mrf.mxu0 }
 0x55b   : > { %v931_v15 = vpop.f32.mrf.mxu1 }
 0x55c   : > { %v2563_v16 = vadd.f32 %v977_v10, %v931_v15 }
 0x55d   : > { %v1809_v17 = vpop.f32.mrf.mxu1 }
 0x55e   : > { %v1721_v17 = vld [vmem:[#allocation3] ss:$0 sm:$0xff] }
 0x55f   : > { %v934_v18 = vpop.f32.mrf.mxu1 }
 0x561   : > { %v1810_v20 = vpop.f32.mrf.mxu1 }
 0x563   : > { %v1027_v21 = vpop.f32.mrf.mxu1 }
 0x564   : > { %v1033_v22 = vmul.f32 0.35355338, %v1027_v21 }
 0x565   : > { %v1821_v23 = vpop.f32.mrf.mxu1 }
 0x566   : > { %v1034_v24 = vadd.f32 %v2520_v19, %v1033_v22 }
 0x567   : > { %v1030_v25 = vpop.f32.mrf.mxu1 }
 0x568   : > { %v1035_v26 = vsel %vm658_vm3, %v1034_v24, -inf }
 0x569   : > { %1036 = vmax.xlane.f32.xlu1 %v1035_v26  ;;  %v1822_v27 = vpop.f32.mrf.mxu1 }
 0x57a   : > { %1147 = vrot.lane.b32.xlu1 %v2500_v12, %s2262_s23 }
 0x57e   : > { %1145 = vrot.lane.b32.xlu1 %v2500_v12, %s2263_s22 }
 0x5f2   : > { %v1037_v28 = vpop.xlane.xlu1 %1036 }
 0x5f3   : > { %v1038_v29 = vsub.f32 %v1034_v24, %v1037_v28 }
 0x5f5   : > { %v1039_v30 = vmul.f32 1.442695, %v1038_v29 }
 0x5f6   : > { %v1148_v38 = vpop.permute.xlu1 %1147 }
 0x5f7   : > { %1993 = vpow2.f32 %v1039_v30  ;;  %v1153_v40 = vsel %vm658_vm3, %v1148_v38, 0  ;;  %v1723_v38 = vld [vmem:[#allocation7] ss:$0 sm:$0xff] }
 0x5fa   : > { %v1146_v41 = vpop.permute.xlu1 %1145 }
 0x604   : > { %v1994_v31 = vpop.eup %1993 }
 0x605   : > { %v1041_v32 = vsel %vm658_vm3, %v1994_v31, 0.0 }
 0x606   : > { %1042 = vadd.xlane.f32.xlu0 %v1041_v32  ;;  %v1980_v32 = vld [vmem:[#allocation8] sm:$0xff]  }
 0x61c   : > { %1047 = vrot.lane.b32.xlu0 %v2500_v12, %s2264_s26 }
 0x68f   : > { %v1043_v33 = vpop.xlane.xlu0 %1042 }
 0x690   : > { %1995 = vrcp.f32 %v1043_v33 }
 0x693   : > { %v1048_v34 = vpop.permute.xlu0 %1047 }
 0x694   : > { %v1053_v35 = vsel %vm730_vm4, %v1048_v34, 0 }
 0x695   : > { %1824 = vmatpush3.bf16.msra.mxu0 %v1053_v35 }
 0x696   : > { %1835 = vmatprep.subr.bf16.mxu0 %v2253_v0 }
 0x69d   : > { %v1996_v36 = vpop.eup %1995 }
 0x69e   : > { %v1045_v37 = vmul.f32 %v1996_v36, %v1994_v31  ;;  %v1979_v31 = vld [vmem:[#allocation8 + $0x8] sm:$0xff]   ;;  %v1722_v36 = vld [vmem:[#allocation5] ss:$0 sm:$0xff] }
 0x6a0   : > { %v1046_v39 = vpack.c.bf16 %v1045_v37, %v1045_v37 }
 0x6a2   : > { %1826 = vmatmul.mubr.msk.bf16.vlgmr.msra.gmra.mxu0 %vm658_vm3, %v1046_v39 }
 0x6a3   : > { %1836 = vmatpush3.bf16.xpose.msra.mxu0 %v1153_v40  ;;  %1837 = vmatprep.mubr.msk.bf16.mxu0 %vm2254_vm0, %v2253_v0 }
 0x6a4   : > { %1847 = vmatprep.subr.bf16.mxu0 %v2253_v0 }
 0x6aa   : > { %1838 = vmatmul.mubr.msk.bf16.vlgmr.msra.gmra.mxu0 %vm658_vm3, %v1146_v41 }
 0x6ab   : > { %1849 = vmatprep.mubr.msk.bf16.mxu0 %vm2254_vm0, %v2253_v0 }
 0x762   : > { %v1089_v44 = vpop.f32.mrf.mxu0 }
 0x763   : > { %v1095_v45 = vpack.c.bf16 %v1089_v44, %v1089_v44  ;;  %v1983_v44 = vld [vmem:[%s2648_s10 + $0x8] sm:$0xff]  }
 0x764   : > { %v1827_v46 = vpop.f32.mrf.mxu0 }
 0x765   : > { %1832 = vmatmul.mubr.msk.bf16.vlgmr.msra.gmra.mxu1 %vm658_vm3, %v1095_v45  ;;  %v1984_v45 = vld [vmem:[%s2648_s10] sm:$0xff]   ;;  %v1724_v46 = vld [vmem:[#allocation10] ss:$0 sm:$0xff] }
 0x766   : > { %v1092_v47 = vpop.f32.mrf.mxu0  ;;  %1843 = vmatprep.mubr.msk.bf16.mxu1 %vm2254_vm0, %v2253_v0 }
 0x768   : > { %v1828_v48 = vpop.f32.mrf.mxu0 }
 0x76a   : > { %v1189_v49 = vpop.f32.mrf.mxu0 }
 0x76b   : > { %v1195_v50 = vmul.f32 0.35355338, %v1189_v49 }
 0x76c   : > { %v1839_v51 = vpop.f32.mrf.mxu0 }
 0x76d   : > { %v1196_v52 = vadd.f32 %v2520_v19, %v1195_v50 }
 0x76e   : > { %v1192_v53 = vpop.f32.mrf.mxu0 }
 0x76f   : > { %v1197_v54 = vsel %vm658_vm3, %v1196_v52, -inf }
 0x770   : > { %1198 = vmax.xlane.f32.xlu0 %v1197_v54  ;;  %v1840_v55 = vpop.f32.mrf.mxu0 }
 0x786   : > { %1209 = vrot.lane.b32.xlu0 %v2500_v12, %s2265_s27  ;;  %v1719_v12 = vld [vmem:[%s2642_s4 + $0xc] sm:$0xf]  ;;  %s579_s27 = scalar_lea.vmem %s2652_s14, %s1699_s17 }
 0x787   : > { %v1264_v4 = vsel %vm730_vm4, %v1719_v12, 0 }
 0x788   : > { %1848 = vmatpush3.bf16.msra.mxu0 %v1264_v4 }
 0x789   : > { %1861 = vmatprep.subr.bf16.mxu0 %v2253_v0 }
 0x7f9   : > { %v1199_v56 = vpop.xlane.xlu0 %1198 }
 0x7fa   : > { %v1200_v57 = vsub.f32 %v1196_v52, %v1199_v56 }
 0x7fc   : > { %v1201_v58 = vmul.f32 1.442695, %v1200_v57 }
 0x7fd   : > { %v1210_v59 = vpop.permute.xlu0 %1209 }
 0x7fe   : > { %1997 = vpow2.f32 %v1201_v58  ;;  %v1215_v60 = vsel %vm730_vm4, %v1210_v59, 0 }
 0x7ff   : > { %1842 = vmatpush3.bf16.msra.mxu1 %v1215_v60 }
 0x800   : > { %1853 = vmatprep.subr.bf16.mxu1 %v2253_v0 }
 0x80b   : > { %v1998_v61 = vpop.eup %1997 }
 0x80c   : > { %v1203_v19 = vsel %vm658_vm3, %v1998_v61, 0.0 }
 0x80d   : > { %1204 = vadd.xlane.f32.xlu1 %v1203_v19 }
 0x825   : > { %v1138_v62 = vpop.f32.mrf.mxu1 }
 0x826   : > { %v1144_v63 = vadd.f32 %v1138_v62, %v2563_v16 }
 0x827   : > { %v1833_v1 = vpop.f32.mrf.mxu1 }
 0x829   : > { %v1141_v2 = vpop.f32.mrf.mxu1 }
 0x82b   : > { %v1834_v5 = vpop.f32.mrf.mxu1 }
 0x896   : > { %v1205_v6 = vpop.xlane.xlu1 %1204 }
 0x897   : > { %1999 = vrcp.f32 %v1205_v6 }
 0x8a4   : > { %v2000_v7 = vpop.eup %1999 }
 0x8a5   : > { %v1207_v8 = vmul.f32 %v2000_v7, %v1998_v61 }
 0x8a7   : > { %v1208_v9 = vpack.c.bf16 %v1207_v8, %v1207_v8 }
 0x8a9   : > { %1844 = vmatmul.mubr.msk.bf16.vlgmr.msra.gmra.mxu1 %vm658_vm3, %v1208_v9 }
 0x8aa   : > { %1857 = vmatprep.mubr.msk.bf16.mxu1 %vm2254_vm0, %v2253_v0  ;;  %1854 = vmatpush3.bf16.msra.mxu1 %v1979_v31 }
 0x8ab   : > { %1855 = vmatprep.subr.bf16.mxu1 %v2253_v0 }
 0x8ae   : > { %1856 = vmatpush3.bf16.msra.mxu1 %v1980_v32 }
 0x969   : > { %v1251_v10 = vpop.f32.mrf.mxu1 }
 0x96a   : > { %v1257_v11 = vpack.c.bf16 %v1251_v10, %v1251_v10 }
 0x96b   : > { %v1845_v13 = vpop.f32.mrf.mxu1 }
 0x96c   : > { %1850 = vmatmul.mubr.msk.bf16.vlgmr.msra.gmra.mxu0 %vm658_vm3, %v1257_v11 }
 0x96d   : > { %v1254_v14 = vpop.f32.mrf.mxu1  ;;  %1869 = vmatprep.mubr.msk.bf16.mxu0 %vm2254_vm0, %v2253_v0  ;;  %1862 = vmatpush3.bf16.msra.mxu0 %v1981_v42 }
 0x96e   : > { %1863 = vmatprep.subr.bf16.mxu0 %v2253_v0 }
 0x96f   : > { %v1846_v15 = vpop.f32.mrf.mxu1 }
 0x970   : > { %v1734_v15 = vld [vmem:[#allocation13] ss:$0 sm:$0xff] }
 0x971   : > { %1864 = vmatpush3.bf16.msra.mxu0 %v1982_v43 }
 0x972   : > { %1865 = vmatprep.subr.bf16.mxu0 %v2253_v0 }
 0x975   : > { %1866 = vmatpush3.bf16.msra.mxu0 %v1983_v44 }
 0x976   : > { %1867 = vmatprep.subr.bf16.mxu0 %v2253_v0  ;;  %v1728_v0 = vld [vmem:[#allocation11] ss:$0 sm:$0xff] }
 0x979   : > { %1868 = vmatpush3.bf16.msra.mxu0 %v1984_v45 }
 0xa2c   : > { %v1300_v16 = vpop.f32.mrf.mxu0 }
 0xa2d   : > { %v1306_v18 = vadd.f32 %v1300_v16, %v1144_v63 }
 0xa2e   : > { %v1851_v20 = vpop.f32.mrf.mxu0 }
 0xa2f   : > { %v1314_v21 = vadd.f32 %v1721_v17, %v1306_v18  ;;  %v1735_v17 = vld [vmem:[#allocation14] ss:$0 sm:$0xff] }
 0xa30   : > { %v1303_v22 = vpop.f32.mrf.mxu0 }
 0xa31   : > { %v1315_v23 = vadd.f32 %v1314_v21, %v2488_v3 }
 0xa32   : > { %v1852_v24 = vpop.f32.mrf.mxu0 }
 0xa33   : > { %v1318_v25 = vsel %vm607_vm1, %v1315_v23, 0.0 }
 0xa34   : > { %1319 = vadd.xlane.f32.xlu1 %v1318_v25 }
 0xabd   : > { %v1320_v26 = vpop.xlane.xlu1 %1319 }
 0xabe   : > { %v1322_v27 = vmul.f32 0.03125, %v1320_v26 }
 0xac0   : > { %v1323_v28 = vsub.f32 %v1315_v23, %v1322_v27 }
 0xac2   : > { %v1324_v29 = vmul.f32 %v1323_v28, %v1323_v28 }
 0xac4   : > { %v1325_v30 = vsel %vm607_vm1, %v1324_v29, 0.0 }
 0xac5   : > { %1326 = vadd.xlane.f32.xlu1 %v1325_v30 }
 0xb4e   : > { %v1327_v33 = vpop.xlane.xlu1 %1326 }
 0xb4f   : > { %v1328_v34 = vmul.f32 0.03125, %v1327_v33 }
 0xb51   : > { %v1329_v3 = vadd.f32 1e-12, %v1328_v34 }
 0xb53   : > { %2001 = vrsqrt.f32 %v1329_v3 }
 0xb60   : > { %v2002_v35 = vpop.eup %2001 }
 0xb61   : > { %v1331_v37 = vmul.f32 %v2002_v35, %v1323_v28 }
 0xb63   : > { %v1338_v39 = vmul.f32 %v1722_v36, %v1331_v37 }
 0xb65   : > { %v1345_v40 = vadd.f32 %v1723_v38, %v1338_v39 }
 0xb67   : > { %v1346_v41 = vpack.c.bf16 %v1345_v40, %v1345_v40 }
 0xb69   : > { %1858 = vmatmul.mubr.msk.bf16.vlgmr.msra.gmra.mxu1 %vm607_vm1, %v1346_v41 }
 0xc29   : > { %v1407_v47 = vpop.f32.mrf.mxu1 }
 0xc2a   : > { %v1408_v48 = vadd.f32 %v1724_v46, %v1407_v47 }
 0xc2b   : > { %v1859_v49 = vpop.f32.mrf.mxu1 }
 0xc2c   : > { %v1414_v50 = vmul.f32 0.044715, %v1408_v48  ;;  %v1413_v58 = vmul.f32 0.5, %v1408_v48 }
 0xc2d   : > { %v1410_v51 = vpop.f32.mrf.mxu1 }
 0xc2e   : > { %v1415_v52 = vmul.f32 %v1414_v50, %v1408_v48 }
 0xc2f   : > { %v1860_v53 = vpop.f32.mrf.mxu1 }
 0xc30   : > { %v1416_v54 = vmul.f32 %v1415_v52, %v1408_v48 }
 0xc32   : > { %v1417_v55 = vadd.f32 %v1416_v54, %v1408_v48 }
 0xc34   : > { %v1418_v56 = vmul.f32 0.7978846, %v1417_v55 }
 0xc36   : > { %2003 = vtanh.f32 %v1418_v56 }
 0xc43   : > { %v2004_v57 = vpop.eup %2003 }
 0xc44   : > { %v1420_v59 = vadd.f32 1.0, %v2004_v57 }
 0xc46   : > { %v1421_v60 = vmul.f32 %v1420_v59, %v1413_v58 }
 0xc48   : > { %v1422_v61 = vpack.c.bf16 %v1421_v60, %v1421_v60 }
 0xc4a   : > { %1870 = vmatmul.mubr.msk.bf16.vlgmr.msra.gmra.mxu0 %vm1462_vm5, %v1422_v61 }
 0xd0a   : > { %v1500_v19 = vpop.f32.mrf.mxu0 }
 0xd0b   : > { %v1501_v62 = vadd.f32 %v1728_v0, %v1500_v19 }
 0xd0c   : > { %v1871_v63 = vpop.f32.mrf.mxu0 }
 0xd0d   : > { %v1506_v1 = vadd.f32 %v1501_v62, %v1345_v40 }
 0xd0e   : > { %v1503_v2 = vpop.f32.mrf.mxu0 }
 0xd0f   : > { %v1509_v12 = vsel %vm607_vm1, %v1506_v1, 0.0 }
 0xd10   : > { %1510 = vadd.xlane.f32.xlu1 %v1509_v12  ;;  %v1872_v4 = vpop.f32.mrf.mxu0 }
 0xd99   : > { %v1511_v5 = vpop.xlane.xlu1 %1510 }
 0xd9a   : > { %v1512_v6 = vmul.f32 0.03125, %v1511_v5 }
 0xd9c   : > { %v1513_v7 = vsub.f32 %v1506_v1, %v1512_v6 }
 0xd9e   : > { %v1514_v8 = vmul.f32 %v1513_v7, %v1513_v7 }
 0xda0   : > { %v1515_v9 = vsel %vm607_vm1, %v1514_v8, 0.0 }
 0xda1   : > { %1516 = vadd.xlane.f32.xlu1 %v1515_v9 }
 0xe2a   : > { %v1517_v10 = vpop.xlane.xlu1 %1516 }
 0xe2b   : > { %v1518_v11 = vmul.f32 0.03125, %v1517_v10 }
 0xe2d   : > { %v1519_v13 = vadd.f32 1e-12, %v1518_v11 }
 0xe2f   : > { %2005 = vrsqrt.f32 %v1519_v13 }
 0xe3c   : > { %v2006_v14 = vpop.eup %2005 }
 0xe3d   : > { %v1521_v16 = vmul.f32 %v2006_v14, %v1513_v7 }
 0xe3f   : > { %v1528_v18 = vmul.f32 %v1734_v15, %v1521_v16 }
 0xe41   : > { %v1535_v20 = vadd.f32 %v1735_v17, %v1528_v18 }
 0xe43   : > { %1536 = vst.msk [vmem:[%s579_s27] sm:$0xff] %vm607_vm1, %v1535_v20 }
 0xe44 PF: > { %s29_s29 = sadd.s32 1, %s2241_s29  }
 0xe45   : > { %p26_p7 = scmp.ge.s32.totalorder %s29_s29, 4  }
 0xe47   :  { %28 = sbr.rel (!%p26_p7) target bundleno = 5 (0x5), region = 145 }
 0xe4c   :  { %1556 = vsyncpa [#allocation4], 1 }
 0xe4d   :  { %1558 = vsyncpa [#allocation4 + $0x1], 1 }
 0xe4e   :  { %1559 = vsyncpa [#allocation6], 1 }
 0xe4f   :  { %1560 = vsyncpa [#allocation9], 1 }
 0xe50   :  { %1561 = vsyncpa [#allocation12], 1 }
 0xe51   :  { %1562 = vsyncpa [#allocation15], 1 }

</bundles_post_ra>
